<compile_context>
chip_gen: v7x
topology: tpu7x:2x2x1
jax: 0.10.0
libtpu: 0.0.40
codegen_flags: <defaults>
</compile_context>

<pallas_src>
import functools

import jax
import jax.numpy as jnp
from jax.experimental import pallas as pl
from jax.experimental.pallas import tpu as pltpu

_VMEM_LIMIT = 32 * 1024 * 1024  # safe scoped-VMEM budget on v5e / v6e / v7x


# ------------------------------ helpers ------------------------------------

def _round_up(x, m):
    return ((x + m - 1) // m) * m


def _fit(dim, target):
    """Return (tile, padded_dim): full dim if it fits, else `target` tiles with
    zero-padding up to a multiple of target (targets are 128/256-aligned)."""
    if dim <= target:
        return dim, dim
    return target, _round_up(dim, target)


def _pad2(x, shape):
    pads = [(0, s - d) for d, s in zip(x.shape, shape)]
    if any(p[1] for p in pads):
        x = jnp.pad(x, pads)
    return x


# --------------------- kernel 1: tiled GEMM + bias (+ReLU) -----------------

def _linear_kernel(x_ref, w_ref, b_ref, o_ref, acc_ref, *, relu):
    @pl.when(pl.program_id(2) == 0)
    def _():
        acc_ref[...] = jnp.zeros_like(acc_ref)

    acc_ref[...] += jnp.dot(x_ref[...], w_ref[...],
                            preferred_element_type=jnp.float32)

    @pl.when(pl.program_id(2) == pl.num_programs(2) - 1)
    def _():
        y = acc_ref[...] + b_ref[...].astype(jnp.float32)
        if relu:
            y = jnp.maximum(y, 0.0)
        o_ref[...] = y.astype(o_ref.dtype)


def linear(x, w, b, *, relu=False, tm=256, tn=256, tk=512):
    """x:[N,K] @ w:[K,M] + b:[M]  (tiled, pipelined, f32 accumulation)."""
    N, K = x.shape
    M = w.shape[1]
    tm_, Np = _fit(N, tm)
    tn_, Mp = _fit(M, tn)
    tk_, Kp = _fit(K, tk)
    x_p = _pad2(x, (Np, Kp))
    w_p = _pad2(w, (Kp, Mp))
    b_p = _pad2(b.reshape(1, M), (1, Mp))
    grid = (Np // tm_, Mp // tn_, Kp // tk_)
    out = pl.pallas_call(
        functools.partial(_linear_kernel, relu=relu),
        out_shape=jax.ShapeDtypeStruct((Np, Mp), x.dtype),
        grid=grid,
        in_specs=[
            pl.BlockSpec((tm_, tk_), lambda i, j, k: (i, k)),
            pl.BlockSpec((tk_, tn_), lambda i, j, k: (k, j)),
            pl.BlockSpec((1, tn_), lambda i, j, k: (0, j)),
        ],
        out_specs=pl.BlockSpec((tm_, tn_), lambda i, j, k: (i, j)),
        scratch_shapes=[pltpu.VMEM((tm_, tn_), jnp.float32)],
        compiler_params=pltpu.CompilerParams(
            dimension_semantics=("parallel", "parallel", "arbitrary"),
            vmem_limit_bytes=_VMEM_LIMIT),
    )(x_p, w_p, b_p)
    if (Np, Mp) != (N, M):
        out = out[:N, :M]
    return out


# ------------------- kernel 2: multi-head self-attention -------------------

def _mha_kernel(qkv_ref, o_ref, *, nhead, scale):
    H = nhead
    # block is [S, 1, 3H, dh]; bring heads to the batch (leading) position.
    qkv = jnp.swapaxes(qkv_ref[...][:, 0], 0, 1)          # [3H, S, dh]
    q = qkv[:H] * scale                                   # [H, S, dh]
    k = qkv[H:2 * H]                                      # [H, S, dh]
    v = qkv[2 * H:]                                       # [H, S, dh]
    # contract last dims directly (no explicit k.T), f32 accumulation on the MXU
    s = jnp.einsum('hqd,hkd->hqk', q, k,
                   preferred_element_type=jnp.float32)    # [H, S, S]
    m = jnp.max(s, axis=-1, keepdims=True)
    p = jnp.exp(s - m)
    denom = jnp.sum(p, axis=-1, keepdims=True)
    p = p * pl.reciprocal(denom, approx=True)
    o = jnp.einsum('hqk,hkd->hqd', p.astype(v.dtype), v,
                   preferred_element_type=jnp.float32)    # [H, S, dh]
    o_ref[...] = jnp.swapaxes(o, 0, 1)[:, None].astype(o_ref.dtype)


def mha_attention(qkv4, *, nhead):
    """qkv4: [S, B, 3H, dh] (Q heads, then K heads, then V heads) -> [S, B, H, dh]."""
    S, B, three_h, dh = qkv4.shape
    assert three_h == 3 * nhead
    scale = 1.0 / float(dh) ** 0.5
    return pl.pallas_call(
        functools.partial(_mha_kernel, nhead=nhead, scale=scale),
        out_shape=jax.ShapeDtypeStruct((S, B, nhead, dh), qkv4.dtype),
        grid=(B,),
        in_specs=[pl.BlockSpec((S, 1, 3 * nhead, dh), lambda b: (0, b, 0, 0))],
        out_specs=pl.BlockSpec((S, 1, nhead, dh), lambda b: (0, b, 0, 0)),
        compiler_params=pltpu.CompilerParams(
            dimension_semantics=("parallel",),
            vmem_limit_bytes=_VMEM_LIMIT),
    )(qkv4)


# --------- kernel 3: out-projection + bias + residual + LayerNorm ----------

def _proj_add_ln_kernel(a_ref, w_ref, b_ref, res_ref, g_ref, bt_ref,
                        o_ref, acc_ref, *, eps):
    @pl.when(pl.program_id(1) == 0)
    def _():
        acc_ref[...] = jnp.zeros_like(acc_ref)

    acc_ref[...] += jnp.dot(a_ref[...], w_ref[...],
                            preferred_element_type=jnp.float32)

    @pl.when(pl.program_id(1) == pl.num_programs(1) - 1)
    def _():
        z = (acc_ref[...] + b_ref[...].astype(jnp.float32)
             + res_ref[...].astype(jnp.float32))
        mu = jnp.mean(z, axis=-1, keepdims=True)
        var = jnp.mean(jnp.square(z - mu), axis=-1, keepdims=True)
        zn = (z - mu) * jax.lax.rsqrt(var + eps)
        o_ref[...] = (zn * g_ref[...].astype(jnp.float32)
                      + bt_ref[...].astype(jnp.float32)).astype(o_ref.dtype)


def proj_add_layernorm(a, w, b, res, gamma, beta, *, eps=1e-5, tm=256, tk=512):
    """LayerNorm(res + a @ w + b); a:[N,K], w:[K,D], res:[N,D]."""
    N, K = a.shape
    D = w.shape[1]
    tm_, Np = _fit(N, tm)
    tk_, Kp = _fit(K, tk)
    a_p = _pad2(a, (Np, Kp))
    w_p = _pad2(w, (Kp, D))
    res_p = _pad2(res, (Np, D))
    b2 = b.reshape(1, D)
    g2 = gamma.reshape(1, D)
    bt2 = beta.reshape(1, D)
    grid = (Np // tm_, Kp // tk_)
    out = pl.pallas_call(
        functools.partial(_proj_add_ln_kernel, eps=eps),
        out_shape=jax.ShapeDtypeStruct((Np, D), a.dtype),
        grid=grid,
        in_specs=[
            pl.BlockSpec((tm_, tk_), lambda i, k: (i, k)),   # a
            pl.BlockSpec((tk_, D), lambda i, k: (k, 0)),     # w
            pl.BlockSpec((1, D), lambda i, k: (0, 0)),       # bias
            pl.BlockSpec((tm_, D), lambda i, k: (i, 0)),     # residual
            pl.BlockSpec((1, D), lambda i, k: (0, 0)),       # gamma
            pl.BlockSpec((1, D), lambda i, k: (0, 0)),       # beta
        ],
        out_specs=pl.BlockSpec((tm_, D), lambda i, k: (i, 0)),
        scratch_shapes=[pltpu.VMEM((tm_, D), jnp.float32)],
        compiler_params=pltpu.CompilerParams(
            dimension_semantics=("parallel", "arbitrary"),
            vmem_limit_bytes=_VMEM_LIMIT),
    )(a_p, w_p, b2, res_p, g2, bt2)
    return out[:N] if Np != N else out


# -------- kernel 4: fused FFN (W1+ReLU+W2) + residual + LayerNorm ----------

def _ffn_ln_kernel(x_ref, w1_ref, b1_ref, w2_ref, b2_ref, g_ref, bt_ref,
                   o_ref, acc_ref, *, eps):
    @pl.when(pl.program_id(1) == 0)
    def _():
        acc_ref[...] = jnp.zeros_like(acc_ref)

    h = jnp.dot(x_ref[...], w1_ref[...], preferred_element_type=jnp.float32)
    h = jnp.maximum(h + b1_ref[...].astype(jnp.float32), 0.0)
    acc_ref[...] += jnp.dot(h.astype(w2_ref.dtype), w2_ref[...],
                            preferred_element_type=jnp.float32)

    @pl.when(pl.program_id(1) == pl.num_programs(1) - 1)
    def _():
        z = (acc_ref[...] + b2_ref[...].astype(jnp.float32)
             + x_ref[...].astype(jnp.float32))
        mu = jnp.mean(z, axis=-1, keepdims=True)
        var = jnp.mean(jnp.square(z - mu), axis=-1, keepdims=True)
        zn = (z - mu) * jax.lax.rsqrt(var + eps)
        o_ref[...] = (zn * g_ref[...].astype(jnp.float32)
                      + bt_ref[...].astype(jnp.float32)).astype(o_ref.dtype)


def ffn_add_layernorm(x, w1, b1, w2, b2, gamma, beta, *, eps=1e-5,
                      tm=256, tf=512):
    """LayerNorm(x + relu(x@w1+b1)@w2 + b2) tiled over the hidden dim."""
    N, D = x.shape
    F = w1.shape[1]
    tm_, Np = _fit(N, tm)
    tf_, Fp = _fit(F, tf)
    x_p = _pad2(x, (Np, D))
    w1_p = _pad2(w1, (D, Fp))
    b1_p = _pad2(b1.reshape(1, F), (1, Fp))
    w2_p = _pad2(w2, (Fp, D))
    b2_2 = b2.reshape(1, D)
    g2 = gamma.reshape(1, D)
    bt2 = beta.reshape(1, D)
    grid = (Np // tm_, Fp // tf_)
    out = pl.pallas_call(
        functools.partial(_ffn_ln_kernel, eps=eps),
        out_shape=jax.ShapeDtypeStruct((Np, D), x.dtype),
        grid=grid,
        in_specs=[
            pl.BlockSpec((tm_, D), lambda i, f: (i, 0)),     # x (also residual)
            pl.BlockSpec((D, tf_), lambda i, f: (0, f)),     # w1
            pl.BlockSpec((1, tf_), lambda i, f: (0, f)),     # b1
            pl.BlockSpec((tf_, D), lambda i, f: (f, 0)),     # w2
            pl.BlockSpec((1, D), lambda i, f: (0, 0)),       # b2
            pl.BlockSpec((1, D), lambda i, f: (0, 0)),       # gamma
            pl.BlockSpec((1, D), lambda i, f: (0, 0)),       # beta
        ],
        out_specs=pl.BlockSpec((tm_, D), lambda i, f: (i, 0)),
        scratch_shapes=[pltpu.VMEM((tm_, D), jnp.float32)],
        compiler_params=pltpu.CompilerParams(
            dimension_semantics=("parallel", "arbitrary"),
            vmem_limit_bytes=_VMEM_LIMIT),
    )(x_p, w1_p, b1_p, w2_p, b2_2, g2, bt2)
    return out[:N] if Np != N else out


# ------------------------- encoder-layer forward ---------------------------

def transformer_encoder_layer(src, params, *, nhead):
    """src: [S, B, D] -> [S, B, D]. Matches PyTorch MyTransformerEncoderLayer
    forward in eval mode (dropouts = identity)."""
    S, B, D = src.shape
    dh = D // nhead
    x = src.reshape(S * B, D)

    # fused QKV projection: [S*B, 3D] -> free reshape to [S, B, 3H, dh]
    qkv = linear(x, params["w_qkv"], params["b_qkv"])
    qkv4 = qkv.reshape(S, B, 3 * nhead, dh)

    # multi-head attention, heads stay in [S, B, H, dh] layout (no transposes)
    attn = mha_attention(qkv4, nhead=nhead).reshape(S * B, D)

    # output projection + residual + LayerNorm1
    x1 = proj_add_layernorm(attn, params["wo"], params["bo"], x,
                            params["ln1_g"], params["ln1_b"])

    # FFN + residual + LayerNorm2
    out = ffn_add_layernorm(x1, params["w1"], params["b1"],
                            params["w2"], params["b2"],
                            params["ln2_g"], params["ln2_b"])
    return out.reshape(S, B, D)


# ------------------------------ param init ---------------------------------

def init_params(key, d_model, nhead, dim_feedforward, dtype=jnp.float32):
    ks = jax.random.split(key, 12)

    def xavier(k, shape):
        limit = (6.0 / (shape[0] + shape[1])) ** 0.5
        return jax.random.uniform(k, shape, dtype, -limit, limit)

    wq = xavier(ks[0], (d_model, d_model))
    wk = xavier(ks[1], (d_model, d_model))
    wv = xavier(ks[2], (d_model, d_model))
    bq = jax.random.normal(ks[4], (d_model,), dtype) * 0.02
    bk = jax.random.normal(ks[5], (d_model,), dtype) * 0.02
    bv = jax.random.normal(ks[6], (d_model,), dtype) * 0.02
    return {
        # weights stored as [Din, Dout] (transposed relative to torch Linear)
        "w_qkv": jnp.concatenate([wq, wk, wv], axis=1),          # [D, 3D]
        "b_qkv": jnp.concatenate([bq, bk, bv]),                  # [3D]
        "wo": xavier(ks[3], (d_model, d_model)),
        "bo": jax.random.normal(ks[7], (d_model,), dtype) * 0.02,
        "w1": xavier(ks[8], (d_model, dim_feedforward)),
        "b1": jax.random.normal(ks[9], (dim_feedforward,), dtype) * 0.02,
        "w2": xavier(ks[10], (dim_feedforward, d_model)),
        "b2": jax.random.normal(ks[11], (d_model,), dtype) * 0.02,
        "ln1_g": jnp.ones((d_model,), dtype),
        "ln1_b": jnp.zeros((d_model,), dtype),
        "ln2_g": jnp.ones((d_model,), dtype),
        "ln2_b": jnp.zeros((d_model,), dtype),
    }


# --------------------------- pure-JAX reference ----------------------------

def _ln(z, g, b, eps=1e-5):
    mu = jnp.mean(z, axis=-1, keepdims=True)
    var = jnp.mean(jnp.square(z - mu), axis=-1, keepdims=True)
    return (z - mu) * jax.lax.rsqrt(var + eps) * g + b


def _reference_forward(src, params, *, nhead):
    S, B, D = src.shape
    dh = D // nhead
    x = src.reshape(S * B, D)
    qkv = (x @ params["w_qkv"] + params["b_qkv"]).reshape(S, B, 3, nhead, dh)
    q, k, v = qkv[:, :, 0], qkv[:, :, 1], qkv[:, :, 2]       # [S,B,H,dh]
    s = jnp.einsum('sbhd,tbhd->bhst', q * (1.0 / dh ** 0.5), k)
    p = jax.nn.softmax(s, axis=-1)
    o = jnp.einsum('bhst,tbhd->sbhd', p, v).reshape(S * B, D)
    x1 = _ln(x + o @ params["wo"] + params["bo"], params["ln1_g"], params["ln1_b"])
    h = jnp.maximum(x1 @ params["w1"] + params["b1"], 0.0)
    ff = h @ params["w2"] + params["b2"]
    return _ln(x1 + ff, params["ln2_g"], params["ln2_b"]).reshape(S, B, D)


if __name__ == "__main__":
    S, B, D, H, F = 8, 2, 32, 4, 64
    key = jax.random.PRNGKey(0)
    k_src, k_par = jax.random.split(key)
    src = jax.random.normal(k_src, (S, B, D), jnp.float32)
    params = init_params(k_par, D, H, F)

    fwd = jax.jit(functools.partial(transformer_encoder_layer, nhead=H))
    out = jax.block_until_ready(fwd(src, params))
    assert out.shape == (S, B, D)

    ref = _reference_forward(src, params, nhead=H)
    err = float(jnp.max(jnp.abs(out - ref)))
    assert err < 1e-2, f"max abs error vs reference: {err}"
    print("KERNEL_OK")
</pallas_src>

<mosaic_0001>
module attributes {stable_mosaic.version = 11 : i64} {
  func.func @_mha_kernel(%arg0: i32, %arg1: memref<8x1x12x8xf32, #tpu.memory_space<vmem>>, %arg2: memref<8x1x4x8xf32, #tpu.memory_space<vmem>>) attributes {dimension_semantics = [#tpu.dimension_semantics<parallel>], iteration_bounds = array<i64: 2>, scalar_prefetch = 0 : i64, scratch_operands = 0 : i64, tpu.core_type = #tpu.core_type<tc>, window_params = [{transform_indices = @transform_0, window_bounds = array<i64: 8, 1, 12, 8>}, {transform_indices = @transform_1, window_bounds = array<i64: 8, 1, 4, 8>}]} {
    %c0 = arith.constant 0 : index
    %c0_0 = arith.constant 0 : index
    %c0_1 = arith.constant 0 : index
    %c0_2 = arith.constant 0 : index
    %0 = vector.load %arg1[%c0, %c0_0, %c0_1, %c0_2] : memref<8x1x12x8xf32, #tpu.memory_space<vmem>>, vector<8x1x12x8xf32>
    %1 = vector.shape_cast %0 : vector<8x1x12x8xf32> to vector<8x12x8xf32>
    %2 = tpu.transpose %1, [1, 0, 2] : vector<8x12x8xf32> -> vector<12x8x8xf32>
    %3 = vector.extract_strided_slice %2 {offsets = [0, 0, 0], sizes = [4, 8, 8], strides = [1, 1, 1]} : vector<12x8x8xf32> to vector<4x8x8xf32>
    %cst = arith.constant 0.353553385 : f32
    %4 = vector.broadcast %cst : f32 to vector<4x8x8xf32>
    %5 = arith.mulf %3, %4 : vector<4x8x8xf32>
    %6 = vector.extract_strided_slice %2 {offsets = [4, 0, 0], sizes = [4, 8, 8], strides = [1, 1, 1]} : vector<12x8x8xf32> to vector<4x8x8xf32>
    %7 = vector.extract_strided_slice %2 {offsets = [8, 0, 0], sizes = [4, 8, 8], strides = [1, 1, 1]} : vector<12x8x8xf32> to vector<4x8x8xf32>
    "tpu.trace_start"() <{level = 10 : i32, message = "hqd,hkd->hqk"}> : () -> ()
    %cst_3 = arith.constant dense<0.000000e+00> : vector<4x8x8xf32>
    %8 = tpu.matmul %5, %6, %cst_3 {dimension_numbers = #tpu.dot_dimension_numbers<[2], [2], [1], [1], [0, 0, 0, 1, 1, 1], [0], [0]>} : vector<4x8x8xf32>, vector<4x8x8xf32>, vector<4x8x8xf32> -> vector<4x8x8xf32>
    "tpu.trace_stop"() : () -> ()
    %cst_4 = arith.constant dense<0xFF800000> : vector<4x8xf32>
    %9 = vector.multi_reduction <maximumf>, %8, %cst_4 [2] : vector<4x8x8xf32> to vector<4x8xf32>
    %10 = vector.shape_cast %9 : vector<4x8xf32> to vector<4x8x1xf32>
    %11 = vector.broadcast %10 : vector<4x8x1xf32> to vector<4x8x8xf32>
    %12 = arith.subf %8, %11 : vector<4x8x8xf32>
    %13 = math.exp %12 : vector<4x8x8xf32>
    %cst_5 = arith.constant dense<0.000000e+00> : vector<4x8xf32>
    %14 = vector.multi_reduction <add>, %13, %cst_5 [2] : vector<4x8x8xf32> to vector<4x8xf32>
    %15 = vector.shape_cast %14 : vector<4x8xf32> to vector<4x8x1xf32>
    %16 = tpu.reciprocal %15 {approx = true} : vector<4x8x1xf32> -> vector<4x8x1xf32>
    %17 = vector.broadcast %16 : vector<4x8x1xf32> to vector<4x8x8xf32>
    %18 = arith.mulf %13, %17 : vector<4x8x8xf32>
    "tpu.trace_start"() <{level = 10 : i32, message = "hqk,hkd->hqd"}> : () -> ()
    %cst_6 = arith.constant dense<0.000000e+00> : vector<4x8x8xf32>
    %19 = tpu.matmul %18, %7, %cst_6 {dimension_numbers = #tpu.dot_dimension_numbers<[2], [1], [1], [2], [0, 0, 0, 1, 1, 2], [0], [0]>} : vector<4x8x8xf32>, vector<4x8x8xf32>, vector<4x8x8xf32> -> vector<4x8x8xf32>
    "tpu.trace_stop"() : () -> ()
    %20 = tpu.transpose %19, [1, 0, 2] : vector<4x8x8xf32> -> vector<8x4x8xf32>
    %21 = vector.shape_cast %20 : vector<8x4x8xf32> to vector<8x1x4x8xf32>
    %c0_7 = arith.constant 0 : index
    %c0_8 = arith.constant 0 : index
    %c0_9 = arith.constant 0 : index
    %c0_10 = arith.constant 0 : index
    %22 = vector.load %arg2[%c0_7, %c0_8, %c0_9, %c0_10] : memref<8x1x4x8xf32, #tpu.memory_space<vmem>>, vector<8x1x4x8xf32>
    tpu.vector_store %arg2[%c0_7, %c0_8, %c0_9, %c0_10], %21 {strides = array<i32>} : memref<8x1x4x8xf32, #tpu.memory_space<vmem>>, vector<8x1x4x8xf32>,
    return
  }
  func.func @transform_0(%arg0: i32) -> (i32, i32, i32, i32) {
    %c0_i32 = arith.constant 0 : i32
    %c0_i32_0 = arith.constant 0 : i32
    %c0_i32_1 = arith.constant 0 : i32
    %c0_i32_2 = arith.constant 0 : i32
    return %c0_i32, %arg0, %c0_i32_0, %c0_i32_1 : i32, i32, i32, i32
  }
  func.func @transform_1(%arg0: i32) -> (i32, i32, i32, i32) {
    %c0_i32 = arith.constant 0 : i32
    %c0_i32_0 = arith.constant 0 : i32
    %c0_i32_1 = arith.constant 0 : i32
    %c0_i32_2 = arith.constant 0 : i32
    return %c0_i32, %arg0, %c0_i32_0, %c0_i32_1 : i32, i32, i32, i32
  }
}

module attributes {stable_mosaic.version = 11 : i64} {
  func.func @_linear_kernel(%arg0: i32, %arg1: i32, %arg2: i32, %arg3: memref<16x32xf32, #tpu.memory_space<vmem>>, %arg4: memref<32x96xf32, #tpu.memory_space<vmem>>, %arg5: memref<1x96xf32, #tpu.memory_space<vmem>>, %arg6: memref<16x96xf32, #tpu.memory_space<vmem>>, %arg7: memref<16x96xf32, #tpu.memory_space<vmem>>) attributes {dimension_semantics = [#tpu.dimension_semantics<parallel>, #tpu.dimension_semantics<parallel>, #tpu.dimension_semantics<arbitrary>], iteration_bounds = array<i64: 1, 1, 1>, scalar_prefetch = 0 : i64, scratch_operands = 1 : i64, tpu.core_type = #tpu.core_type<tc>, window_params = [{transform_indices = @transform_0, window_bounds = array<i64: 16, 32>}, {transform_indices = @transform_1, window_bounds = array<i64: 32, 96>}, {transform_indices = @transform_2, window_bounds = array<i64: 1, 96>}, {transform_indices = @transform_3, window_bounds = array<i64: 16, 96>}]} {
    %c0_i32 = arith.constant 0 : i32
    %0 = arith.cmpi eq, %arg2, %c0_i32 : i32
    %1 = arith.extui %0 : i1 to i32
    %c0_i32_0 = arith.constant 0 : i32
    %2 = arith.cmpi ne, %1, %c0_i32_0 : i32
    scf.if %2 {
      %cst_10 = arith.constant 0.000000e+00 : f32
      %12 = vector.broadcast %cst_10 : f32 to vector<16x96xf32>
      %c0_11 = arith.constant 0 : index
      %c0_12 = arith.constant 0 : index
      %13 = vector.load %arg7[%c0_11, %c0_12] : memref<16x96xf32, #tpu.memory_space<vmem>>, vector<16x96xf32>
      tpu.vector_store %arg7[%c0_11, %c0_12], %12 {strides = array<i32>} : memref<16x96xf32, #tpu.memory_space<vmem>>, vector<16x96xf32>,
    } else {
    }
    %c0 = arith.constant 0 : index
    %c0_1 = arith.constant 0 : index
    %3 = vector.load %arg7[%c0, %c0_1] : memref<16x96xf32, #tpu.memory_space<vmem>>, vector<16x96xf32>
    %c0_2 = arith.constant 0 : index
    %c0_3 = arith.constant 0 : index
    %4 = vector.load %arg3[%c0_2, %c0_3] : memref<16x32xf32, #tpu.memory_space<vmem>>, vector<16x32xf32>
    %c0_4 = arith.constant 0 : index
    %c0_5 = arith.constant 0 : index
    %5 = vector.load %arg4[%c0_4, %c0_5] : memref<32x96xf32, #tpu.memory_space<vmem>>, vector<32x96xf32>
    %cst = arith.constant dense<0.000000e+00> : vector<16x96xf32>
    %6 = tpu.matmul %4, %5, %cst {dimension_numbers = #tpu.dot_dimension_numbers<[1], [0], [0], [1], [0, 0, 1, 1], [], []>} : vector<16x32xf32>, vector<32x96xf32>, vector<16x96xf32> -> vector<16x96xf32>
    %7 = arith.addf %3, %6 : vector<16x96xf32>
    %c0_6 = arith.constant 0 : index
    %c0_7 = arith.constant 0 : index
    %8 = vector.load %arg7[%c0_6, %c0_7] : memref<16x96xf32, #tpu.memory_space<vmem>>, vector<16x96xf32>
    tpu.vector_store %arg7[%c0_6, %c0_7], %7 {strides = array<i32>} : memref<16x96xf32, #tpu.memory_space<vmem>>, vector<16x96xf32>,
    %c0_i32_8 = arith.constant 0 : i32
    %9 = arith.cmpi eq, %arg2, %c0_i32_8 : i32
    %10 = arith.extui %9 : i1 to i32
    %c0_i32_9 = arith.constant 0 : i32
    %11 = arith.cmpi ne, %10, %c0_i32_9 : i32
    scf.if %11 {
      %c0_10 = arith.constant 0 : index
      %c0_11 = arith.constant 0 : index
      %12 = vector.load %arg7[%c0_10, %c0_11] : memref<16x96xf32, #tpu.memory_space<vmem>>, vector<16x96xf32>
      %c0_12 = arith.constant 0 : index
      %c0_13 = arith.constant 0 : index
      %13 = vector.load %arg5[%c0_12, %c0_13] : memref<1x96xf32, #tpu.memory_space<vmem>>, vector<1x96xf32>
      %14 = vector.broadcast %13 : vector<1x96xf32> to vector<16x96xf32>
      %15 = arith.addf %12, %14 : vector<16x96xf32>
      %c0_14 = arith.constant 0 : index
      %c0_15 = arith.constant 0 : index
      %16 = vector.load %arg6[%c0_14, %c0_15] : memref<16x96xf32, #tpu.memory_space<vmem>>, vector<16x96xf32>
      tpu.vector_store %arg6[%c0_14, %c0_15], %15 {strides = array<i32>} : memref<16x96xf32, #tpu.memory_space<vmem>>, vector<16x96xf32>,
    } else {
    }
    return
  }
  func.func @transform_0(%arg0: i32, %arg1: i32, %arg2: i32) -> (i32, i32) {
    %c0_i32 = arith.constant 0 : i32
    return %arg0, %arg2 : i32, i32
  }
  func.func @transform_1(%arg0: i32, %arg1: i32, %arg2: i32) -> (i32, i32) {
    %c0_i32 = arith.constant 0 : i32
    return %arg2, %arg1 : i32, i32
  }
  func.func @transform_2(%arg0: i32, %arg1: i32, %arg2: i32) -> (i32, i32) {
    %c0_i32 = arith.constant 0 : i32
    %c0_i32_0 = arith.constant 0 : i32
    return %c0_i32, %arg1 : i32, i32
  }
  func.func @transform_3(%arg0: i32, %arg1: i32, %arg2: i32) -> (i32, i32) {
    %c0_i32 = arith.constant 0 : i32
    return %arg0, %arg1 : i32, i32
  }
}

module attributes {stable_mosaic.version = 11 : i64} {
  func.func @_proj_add_ln_kernel(%arg0: i32, %arg1: i32, %arg2: memref<16x32xf32, #tpu.memory_space<vmem>>, %arg3: memref<32x32xf32, #tpu.memory_space<vmem>>, %arg4: memref<1x32xf32, #tpu.memory_space<vmem>>, %arg5: memref<16x32xf32, #tpu.memory_space<vmem>>, %arg6: memref<1x32xf32, #tpu.memory_space<vmem>>, %arg7: memref<1x32xf32, #tpu.memory_space<vmem>>, %arg8: memref<16x32xf32, #tpu.memory_space<vmem>>, %arg9: memref<16x32xf32, #tpu.memory_space<vmem>>) attributes {dimension_semantics = [#tpu.dimension_semantics<parallel>, #tpu.dimension_semantics<arbitrary>], iteration_bounds = array<i64: 1, 1>, scalar_prefetch = 0 : i64, scratch_operands = 1 : i64, tpu.core_type = #tpu.core_type<tc>, window_params = [{transform_indices = @transform_0, window_bounds = array<i64: 16, 32>}, {transform_indices = @transform_1, window_bounds = array<i64: 32, 32>}, {pipeline_mode = #tpu.pipeline_mode<synchronous>, transform_indices = @transform_2, window_bounds = array<i64: 1, 32>}, {transform_indices = @transform_3, window_bounds = array<i64: 16, 32>}, {pipeline_mode = #tpu.pipeline_mode<synchronous>, transform_indices = @transform_4, window_bounds = array<i64: 1, 32>}, {pipeline_mode = #tpu.pipeline_mode<synchronous>, transform_indices = @transform_5, window_bounds = array<i64: 1, 32>}, {transform_indices = @transform_6, window_bounds = array<i64: 16, 32>}]} {
    %c0_i32 = arith.constant 0 : i32
    %0 = arith.cmpi eq, %arg1, %c0_i32 : i32
    %1 = arith.extui %0 : i1 to i32
    %c0_i32_0 = arith.constant 0 : i32
    %2 = arith.cmpi ne, %1, %c0_i32_0 : i32
    scf.if %2 {
      %cst_10 = arith.constant 0.000000e+00 : f32
      %12 = vector.broadcast %cst_10 : f32 to vector<16x32xf32>
      %c0_11 = arith.constant 0 : index
      %c0_12 = arith.constant 0 : index
      %13 = vector.load %arg9[%c0_11, %c0_12] : memref<16x32xf32, #tpu.memory_space<vmem>>, vector<16x32xf32>
      tpu.vector_store %arg9[%c0_11, %c0_12], %12 {strides = array<i32>} : memref<16x32xf32, #tpu.memory_space<vmem>>, vector<16x32xf32>,
    } else {
    }
    %c0 = arith.constant 0 : index
    %c0_1 = arith.constant 0 : index
    %3 = vector.load %arg9[%c0, %c0_1] : memref<16x32xf32, #tpu.memory_space<vmem>>, vector<16x32xf32>
    %c0_2 = arith.constant 0 : index
    %c0_3 = arith.constant 0 : index
    %4 = vector.load %arg2[%c0_2, %c0_3] : memref<16x32xf32, #tpu.memory_space<vmem>>, vector<16x32xf32>
    %c0_4 = arith.constant 0 : index
    %c0_5 = arith.constant 0 : index
    %5 = vector.load %arg3[%c0_4, %c0_5] : memref<32x32xf32, #tpu.memory_space<vmem>>, vector<32x32xf32>
    %cst = arith.constant dense<0.000000e+00> : vector<16x32xf32>
    %6 = tpu.matmul %4, %5, %cst {dimension_numbers = #tpu.dot_dimension_numbers<[1], [0], [0], [1], [0, 0, 1, 1], [], []>} : vector<16x32xf32>, vector<32x32xf32>, vector<16x32xf32> -> vector<16x32xf32>
    %7 = arith.addf %3, %6 : vector<16x32xf32>
    %c0_6 = arith.constant 0 : index
    %c0_7 = arith.constant 0 : index
    %8 = vector.load %arg9[%c0_6, %c0_7] : memref<16x32xf32, #tpu.memory_space<vmem>>, vector<16x32xf32>
    tpu.vector_store %arg9[%c0_6, %c0_7], %7 {strides = array<i32>} : memref<16x32xf32, #tpu.memory_space<vmem>>, vector<16x32xf32>,
    %c0_i32_8 = arith.constant 0 : i32
    %9 = arith.cmpi eq, %arg1, %c0_i32_8 : i32
    %10 = arith.extui %9 : i1 to i32
    %c0_i32_9 = arith.constant 0 : i32
    %11 = arith.cmpi ne, %10, %c0_i32_9 : i32
    scf.if %11 {
      %c0_10 = arith.constant 0 : index
      %c0_11 = arith.constant 0 : index
      %12 = vector.load %arg9[%c0_10, %c0_11] : memref<16x32xf32, #tpu.memory_space<vmem>>, vector<16x32xf32>
      %c0_12 = arith.constant 0 : index
      %c0_13 = arith.constant 0 : index
      %13 = vector.load %arg4[%c0_12, %c0_13] : memref<1x32xf32, #tpu.memory_space<vmem>>, vector<1x32xf32>
      %14 = vector.broadcast %13 : vector<1x32xf32> to vector<16x32xf32>
      %15 = arith.addf %12, %14 : vector<16x32xf32>
      %c0_14 = arith.constant 0 : index
      %c0_15 = arith.constant 0 : index
      %16 = vector.load %arg5[%c0_14, %c0_15] : memref<16x32xf32, #tpu.memory_space<vmem>>, vector<16x32xf32>
      %17 = arith.addf %15, %16 : vector<16x32xf32>
      %cst_16 = arith.constant dense<0.000000e+00> : vector<16xf32>
      %18 = vector.multi_reduction <add>, %17, %cst_16 [1] : vector<16x32xf32> to vector<16xf32>
      %19 = vector.shape_cast %18 : vector<16xf32> to vector<16x1xf32>
      %cst_17 = arith.constant 3.200000e+01 : f32
      %20 = vector.broadcast %cst_17 : f32 to vector<16x1xf32>
      %21 = arith.divf %19, %20 : vector<16x1xf32>
      %22 = vector.broadcast %21 : vector<16x1xf32> to vector<16x32xf32>
      %23 = arith.subf %17, %22 : vector<16x32xf32>
      %24 = arith.mulf %23, %23 : vector<16x32xf32>
      %cst_18 = arith.constant dense<0.000000e+00> : vector<16xf32>
      %25 = vector.multi_reduction <add>, %24, %cst_18 [1] : vector<16x32xf32> to vector<16xf32>
      %26 = vector.shape_cast %25 : vector<16xf32> to vector<16x1xf32>
      %cst_19 = arith.constant 3.200000e+01 : f32
      %27 = vector.broadcast %cst_19 : f32 to vector<16x1xf32>
      %28 = arith.divf %26, %27 : vector<16x1xf32>
      %29 = vector.broadcast %21 : vector<16x1xf32> to vector<16x32xf32>
      %30 = arith.subf %17, %29 : vector<16x32xf32>
      %cst_20 = arith.constant 9.99999974E-6 : f32
      %31 = vector.broadcast %cst_20 : f32 to vector<16x1xf32>
      %32 = arith.addf %28, %31 : vector<16x1xf32>
      %33 = math.rsqrt %32 : vector<16x1xf32>
      %34 = vector.broadcast %33 : vector<16x1xf32> to vector<16x32xf32>
      %35 = arith.mulf %30, %34 : vector<16x32xf32>
      %c0_21 = arith.constant 0 : index
      %c0_22 = arith.constant 0 : index
      %36 = vector.load %arg6[%c0_21, %c0_22] : memref<1x32xf32, #tpu.memory_space<vmem>>, vector<1x32xf32>
      %37 = vector.broadcast %36 : vector<1x32xf32> to vector<16x32xf32>
      %38 = arith.mulf %35, %37 : vector<16x32xf32>
      %c0_23 = arith.constant 0 : index
      %c0_24 = arith.constant 0 : index
      %39 = vector.load %arg7[%c0_23, %c0_24] : memref<1x32xf32, #tpu.memory_space<vmem>>, vector<1x32xf32>
      %40 = vector.broadcast %39 : vector<1x32xf32> to vector<16x32xf32>
      %41 = arith.addf %38, %40 : vector<16x32xf32>
      %c0_25 = arith.constant 0 : index
      %c0_26 = arith.constant 0 : index
      %42 = vector.load %arg8[%c0_25, %c0_26] : memref<16x32xf32, #tpu.memory_space<vmem>>, vector<16x32xf32>
      tpu.vector_store %arg8[%c0_25, %c0_26], %41 {strides = array<i32>} : memref<16x32xf32, #tpu.memory_space<vmem>>, vector<16x32xf32>,
    } else {
    }
    return
  }
  func.func @transform_0(%arg0: i32, %arg1: i32) -> (i32, i32) {
    %c0_i32 = arith.constant 0 : i32
    return %arg0, %arg1 : i32, i32
  }
  func.func @transform_1(%arg0: i32, %arg1: i32) -> (i32, i32) {
    %c0_i32 = arith.constant 0 : i32
    %c0_i32_0 = arith.constant 0 : i32
    return %arg1, %c0_i32 : i32, i32
  }
  func.func @transform_2(%arg0: i32, %arg1: i32) -> (i32, i32) {
    %c0_i32 = arith.constant 0 : i32
    %c0_i32_0 = arith.constant 0 : i32
    %c0_i32_1 = arith.constant 0 : i32
    return %c0_i32, %c0_i32_0 : i32, i32
  }
  func.func @transform_3(%arg0: i32, %arg1: i32) -> (i32, i32) {
    %c0_i32 = arith.constant 0 : i32
    %c0_i32_0 = arith.constant 0 : i32
    return %arg0, %c0_i32 : i32, i32
  }
  func.func @transform_4(%arg0: i32, %arg1: i32) -> (i32, i32) {
    %c0_i32 = arith.constant 0 : i32
    %c0_i32_0 = arith.constant 0 : i32
    %c0_i32_1 = arith.constant 0 : i32
    return %c0_i32, %c0_i32_0 : i32, i32
  }
  func.func @transform_5(%arg0: i32, %arg1: i32) -> (i32, i32) {
    %c0_i32 = arith.constant 0 : i32
    %c0_i32_0 = arith.constant 0 : i32
    %c0_i32_1 = arith.constant 0 : i32
    return %c0_i32, %c0_i32_0 : i32, i32
  }
  func.func @transform_6(%arg0: i32, %arg1: i32) -> (i32, i32) {
    %c0_i32 = arith.constant 0 : i32
    %c0_i32_0 = arith.constant 0 : i32
    return %arg0, %c0_i32 : i32, i32
  }
}

module attributes {stable_mosaic.version = 11 : i64} {
  func.func @_ffn_ln_kernel(%arg0: i32, %arg1: i32, %arg2: memref<16x32xf32, #tpu.memory_space<vmem>>, %arg3: memref<32x64xf32, #tpu.memory_space<vmem>>, %arg4: memref<1x64xf32, #tpu.memory_space<vmem>>, %arg5: memref<64x32xf32, #tpu.memory_space<vmem>>, %arg6: memref<1x32xf32, #tpu.memory_space<vmem>>, %arg7: memref<1x32xf32, #tpu.memory_space<vmem>>, %arg8: memref<1x32xf32, #tpu.memory_space<vmem>>, %arg9: memref<16x32xf32, #tpu.memory_space<vmem>>, %arg10: memref<16x32xf32, #tpu.memory_space<vmem>>) attributes {dimension_semantics = [#tpu.dimension_semantics<parallel>, #tpu.dimension_semantics<arbitrary>], iteration_bounds = array<i64: 1, 1>, scalar_prefetch = 0 : i64, scratch_operands = 1 : i64, tpu.core_type = #tpu.core_type<tc>, window_params = [{transform_indices = @transform_0, window_bounds = array<i64: 16, 32>}, {transform_indices = @transform_1, window_bounds = array<i64: 32, 64>}, {transform_indices = @transform_2, window_bounds = array<i64: 1, 64>}, {transform_indices = @transform_3, window_bounds = array<i64: 64, 32>}, {pipeline_mode = #tpu.pipeline_mode<synchronous>, transform_indices = @transform_4, window_bounds = array<i64: 1, 32>}, {pipeline_mode = #tpu.pipeline_mode<synchronous>, transform_indices = @transform_5, window_bounds = array<i64: 1, 32>}, {pipeline_mode = #tpu.pipeline_mode<synchronous>, transform_indices = @transform_6, window_bounds = array<i64: 1, 32>}, {transform_indices = @transform_7, window_bounds = array<i64: 16, 32>}]} {
    %c0_i32 = arith.constant 0 : i32
    %0 = arith.cmpi eq, %arg1, %c0_i32 : i32
    %1 = arith.extui %0 : i1 to i32
    %c0_i32_0 = arith.constant 0 : i32
    %2 = arith.cmpi ne, %1, %c0_i32_0 : i32
    scf.if %2 {
      %cst_16 = arith.constant 0.000000e+00 : f32
      %19 = vector.broadcast %cst_16 : f32 to vector<16x32xf32>
      %c0_17 = arith.constant 0 : index
      %c0_18 = arith.constant 0 : index
      %20 = vector.load %arg10[%c0_17, %c0_18] : memref<16x32xf32, #tpu.memory_space<vmem>>, vector<16x32xf32>
      tpu.vector_store %arg10[%c0_17, %c0_18], %19 {strides = array<i32>} : memref<16x32xf32, #tpu.memory_space<vmem>>, vector<16x32xf32>,
    } else {
    }
    %c0 = arith.constant 0 : index
    %c0_1 = arith.constant 0 : index
    %3 = vector.load %arg2[%c0, %c0_1] : memref<16x32xf32, #tpu.memory_space<vmem>>, vector<16x32xf32>
    %c0_2 = arith.constant 0 : index
    %c0_3 = arith.constant 0 : index
    %4 = vector.load %arg3[%c0_2, %c0_3] : memref<32x64xf32, #tpu.memory_space<vmem>>, vector<32x64xf32>
    %cst = arith.constant dense<0.000000e+00> : vector<16x64xf32>
    %5 = tpu.matmul %3, %4, %cst {dimension_numbers = #tpu.dot_dimension_numbers<[1], [0], [0], [1], [0, 0, 1, 1], [], []>} : vector<16x32xf32>, vector<32x64xf32>, vector<16x64xf32> -> vector<16x64xf32>
    %c0_4 = arith.constant 0 : index
    %c0_5 = arith.constant 0 : index
    %6 = vector.load %arg4[%c0_4, %c0_5] : memref<1x64xf32, #tpu.memory_space<vmem>>, vector<1x64xf32>
    %7 = vector.broadcast %6 : vector<1x64xf32> to vector<16x64xf32>
    %8 = arith.addf %5, %7 : vector<16x64xf32>
    %cst_6 = arith.constant 0.000000e+00 : f32
    %9 = vector.broadcast %cst_6 : f32 to vector<16x64xf32>
    %10 = arith.maximumf %8, %9 : vector<16x64xf32>
    %c0_7 = arith.constant 0 : index
    %c0_8 = arith.constant 0 : index
    %11 = vector.load %arg10[%c0_7, %c0_8] : memref<16x32xf32, #tpu.memory_space<vmem>>, vector<16x32xf32>
    %c0_9 = arith.constant 0 : index
    %c0_10 = arith.constant 0 : index
    %12 = vector.load %arg5[%c0_9, %c0_10] : memref<64x32xf32, #tpu.memory_space<vmem>>, vector<64x32xf32>
    %cst_11 = arith.constant dense<0.000000e+00> : vector<16x32xf32>
    %13 = tpu.matmul %10, %12, %cst_11 {dimension_numbers = #tpu.dot_dimension_numbers<[1], [0], [0], [1], [0, 0, 1, 1], [], []>} : vector<16x64xf32>, vector<64x32xf32>, vector<16x32xf32> -> vector<16x32xf32>
    %14 = arith.addf %11, %13 : vector<16x32xf32>
    %c0_12 = arith.constant 0 : index
    %c0_13 = arith.constant 0 : index
    %15 = vector.load %arg10[%c0_12, %c0_13] : memref<16x32xf32, #tpu.memory_space<vmem>>, vector<16x32xf32>
    tpu.vector_store %arg10[%c0_12, %c0_13], %14 {strides = array<i32>} : memref<16x32xf32, #tpu.memory_space<vmem>>, vector<16x32xf32>,
    %c0_i32_14 = arith.constant 0 : i32
    %16 = arith.cmpi eq, %arg1, %c0_i32_14 : i32
    %17 = arith.extui %16 : i1 to i32
    %c0_i32_15 = arith.constant 0 : i32
    %18 = arith.cmpi ne, %17, %c0_i32_15 : i32
    scf.if %18 {
      %c0_16 = arith.constant 0 : index
      %c0_17 = arith.constant 0 : index
      %19 = vector.load %arg10[%c0_16, %c0_17] : memref<16x32xf32, #tpu.memory_space<vmem>>, vector<16x32xf32>
      %c0_18 = arith.constant 0 : index
      %c0_19 = arith.constant 0 : index
      %20 = vector.load %arg6[%c0_18, %c0_19] : memref<1x32xf32, #tpu.memory_space<vmem>>, vector<1x32xf32>
      %21 = vector.broadcast %20 : vector<1x32xf32> to vector<16x32xf32>
      %22 = arith.addf %19, %21 : vector<16x32xf32>
      %c0_20 = arith.constant 0 : index
      %c0_21 = arith.constant 0 : index
      %23 = vector.load %arg2[%c0_20, %c0_21] : memref<16x32xf32, #tpu.memory_space<vmem>>, vector<16x32xf32>
      %24 = arith.addf %22, %23 : vector<16x32xf32>
      %cst_22 = arith.constant dense<0.000000e+00> : vector<16xf32>
      %25 = vector.multi_reduction <add>, %24, %cst_22 [1] : vector<16x32xf32> to vector<16xf32>
      %26 = vector.shape_cast %25 : vector<16xf32> to vector<16x1xf32>
      %cst_23 = arith.constant 3.200000e+01 : f32
      %27 = vector.broadcast %cst_23 : f32 to vector<16x1xf32>
      %28 = arith.divf %26, %27 : vector<16x1xf32>
      %29 = vector.broadcast %28 : vector<16x1xf32> to vector<16x32xf32>
      %30 = arith.subf %24, %29 : vector<16x32xf32>
      %31 = arith.mulf %30, %30 : vector<16x32xf32>
      %cst_24 = arith.constant dense<0.000000e+00> : vector<16xf32>
      %32 = vector.multi_reduction <add>, %31, %cst_24 [1] : vector<16x32xf32> to vector<16xf32>
      %33 = vector.shape_cast %32 : vector<16xf32> to vector<16x1xf32>
      %cst_25 = arith.constant 3.200000e+01 : f32
      %34 = vector.broadcast %cst_25 : f32 to vector<16x1xf32>
      %35 = arith.divf %33, %34 : vector<16x1xf32>
      %36 = vector.broadcast %28 : vector<16x1xf32> to vector<16x32xf32>
      %37 = arith.subf %24, %36 : vector<16x32xf32>
      %cst_26 = arith.constant 9.99999974E-6 : f32
      %38 = vector.broadcast %cst_26 : f32 to vector<16x1xf32>
      %39 = arith.addf %35, %38 : vector<16x1xf32>
      %40 = math.rsqrt %39 : vector<16x1xf32>
      %41 = vector.broadcast %40 : vector<16x1xf32> to vector<16x32xf32>
      %42 = arith.mulf %37, %41 : vector<16x32xf32>
      %c0_27 = arith.constant 0 : index
      %c0_28 = arith.constant 0 : index
      %43 = vector.load %arg7[%c0_27, %c0_28] : memref<1x32xf32, #tpu.memory_space<vmem>>, vector<1x32xf32>
      %44 = vector.broadcast %43 : vector<1x32xf32> to vector<16x32xf32>
      %45 = arith.mulf %42, %44 : vector<16x32xf32>
      %c0_29 = arith.constant 0 : index
      %c0_30 = arith.constant 0 : index
      %46 = vector.load %arg8[%c0_29, %c0_30] : memref<1x32xf32, #tpu.memory_space<vmem>>, vector<1x32xf32>
      %47 = vector.broadcast %46 : vector<1x32xf32> to vector<16x32xf32>
      %48 = arith.addf %45, %47 : vector<16x32xf32>
      %c0_31 = arith.constant 0 : index
      %c0_32 = arith.constant 0 : index
      %49 = vector.load %arg9[%c0_31, %c0_32] : memref<16x32xf32, #tpu.memory_space<vmem>>, vector<16x32xf32>
      tpu.vector_store %arg9[%c0_31, %c0_32], %48 {strides = array<i32>} : memref<16x32xf32, #tpu.memory_space<vmem>>, vector<16x32xf32>,
    } else {
    }
    return
  }
  func.func @transform_0(%arg0: i32, %arg1: i32) -> (i32, i32) {
    %c0_i32 = arith.constant 0 : i32
    %c0_i32_0 = arith.constant 0 : i32
    return %arg0, %c0_i32 : i32, i32
  }
  func.func @transform_1(%arg0: i32, %arg1: i32) -> (i32, i32) {
    %c0_i32 = arith.constant 0 : i32
    %c0_i32_0 = arith.constant 0 : i32
    return %c0_i32, %arg1 : i32, i32
  }
  func.func @transform_2(%arg0: i32, %arg1: i32) -> (i32, i32) {
    %c0_i32 = arith.constant 0 : i32
    %c0_i32_0 = arith.constant 0 : i32
    return %c0_i32, %arg1 : i32, i32
  }
  func.func @transform_3(%arg0: i32, %arg1: i32) -> (i32, i32) {
    %c0_i32 = arith.constant 0 : i32
    %c0_i32_0 = arith.constant 0 : i32
    return %arg1, %c0_i32 : i32, i32
  }
  func.func @transform_4(%arg0: i32, %arg1: i32) -> (i32, i32) {
    %c0_i32 = arith.constant 0 : i32
    %c0_i32_0 = arith.constant 0 : i32
    %c0_i32_1 = arith.constant 0 : i32
    return %c0_i32, %c0_i32_0 : i32, i32
  }
  func.func @transform_5(%arg0: i32, %arg1: i32) -> (i32, i32) {
    %c0_i32 = arith.constant 0 : i32
    %c0_i32_0 = arith.constant 0 : i32
    %c0_i32_1 = arith.constant 0 : i32
    return %c0_i32, %c0_i32_0 : i32, i32
  }
  func.func @transform_6(%arg0: i32, %arg1: i32) -> (i32, i32) {
    %c0_i32 = arith.constant 0 : i32
    %c0_i32_0 = arith.constant 0 : i32
    %c0_i32_1 = arith.constant 0 : i32
    return %c0_i32, %c0_i32_0 : i32, i32
  }
  func.func @transform_7(%arg0: i32, %arg1: i32) -> (i32, i32) {
    %c0_i32 = arith.constant 0 : i32
    %c0_i32_0 = arith.constant 0 : i32
    return %arg0, %c0_i32 : i32, i32
  }
}

</mosaic_0001>

<bundles_post_ra>
// kernel: transformer_encoder_layer.4
= control target key start
LH: loop header
LB: loop body
LE: loop exit
PB: predicated region body
PF: predicated region fallthrough
CT: control target
= control target key end

     0   :  { %8 = vsyncpa [#allocation4], 0  ;;  %s207_s12 = smov [#allocation3]   ;;  %s264_s0 = inlined_call_operand.vmem [shape: f32[16,32], index: 0, kind: input, shape index: {}]   ;;  %s265_s1 = inlined_call_operand.hbm [shape: f32[32,96], index: 1, kind: input, shape index: {}]   ;;  %s266_s2 = inlined_call_operand.vmem [shape: f32[1,96], index: 2, kind: input, shape index: {}]   ;;  %s267_s3 = inlined_call_operand.vmem [shape: f32[16,96], index: 3, kind: output, shape index: {}]  }
   0x1   :  { %s16_s13 = sshll.u32 %s207_s12, 4  ;;  %s183_s16 = scalar_lea.hbm %s265_s1, 512  ;;  %s17_s13 = int_to_ptr.vmem [resolvable:$true] %s16_s13 }
   0x2   :  { %p184_p0 = scmp.ne.s32.totalorder %s265_s1, %s183_s16  ;;  %p187_p1 = scmp.lt.u32.totalorder %s183_s16, %s265_s1 }
   0x4   :  { %p189_p2 = pnand %p187_p1, %p184_p0 }
   0x6   :  { %192 = shalt.err (!%p189_p2)
}
   0x7   :  { %s193_s21 = scalar_lea.vmem %s17_s13, 512  ;;  %p198_p4 = scmp.lt.s32.totalorder %s17_s13, %s17_s13 }
   0x8   :  { %p194_p3 = scmp.ne.s32.totalorder %s17_s13, %s193_s21  ;;  %p199_p5 = scmp.lt.s32.totalorder %s193_s21, %s193_s21 }
   0xa   :  { %p200_p6 = por %p199_p5, %p198_p4 }
   0xc   :  { %p201_p7 = pnand %p200_p6, %p194_p3 }
   0xe   :  { %204 = shalt.err (!%p201_p7)
}
   0xf   :  { %s208_s22 = smov 128   ;;  %s209_s23 = smov 8  }
  0x10   :  { %22 = dma.hbm_to_vmem [thread:$0]  %s265_s1, 512, %s17_s13, [#allocation4], %s208_s22, %s208_s22, %s209_s23  }
  0x11   :  { %205 = dma.done.wait [#allocation4], 512  }
  0x12   :  { %206 = vsyncadd [#allocation4], 4294966784  ;;  %vm32_vm0 = vcmask 785408   ;;  %v210_v0 = vmov 0.0   ;;  %vm43_vm1 = vcmask 261120   ;;  %v39_v1 = vld [vmem:[#allocation3] sm:$0xff] }
  0x13   :  { %34 = vst.msk [vmem:[#allocation2 + $0x8] sm:$0xff] %vm32_vm0, %v210_v0  ;;  %33 = vst.msk [vmem:[#allocation2] sm:$0xff] %vm32_vm0, %v210_v0  ;;  %v40_v2 = vld [vmem:[#allocation3 + $0x8] sm:$0xff]  ;;  %v41_v3 = vld [vmem:[#allocation3 + $0x10] sm:$0xff] }
  0x14   :  { %v171_v4 = vpack.c.bf16 %v40_v2, %v39_v1  ;;  %v42_v5 = vld [vmem:[#allocation3 + $0x18] sm:$0xff]  ;;  %v37_v6 = vld [vmem:[%s264_s0] sm:$0xff] }
  0x15   :  { %v175_v7 = vpack.c.bf16 %v42_v5, %v41_v3  ;;  %168 = vmatprep.mubr.msk.f32.mxu0 %vm43_vm1, %v37_v6  ;;  %v38_v8 = vld [vmem:[%s264_s0 + $0x8] sm:$0xff]  ;;  %v153_v15 = vld [vmem:[%s266_s2] ss:$0 sm:$0xff] }
  0x16   :  { %172 = vmatprep.subr.bf16.mxu0 %v171_v4 }
  0x17   :  { %174 = vmatpush3.bf16.msra.mxu0 %v171_v4 }
  0x18   :  { %176 = vmatprep.subr.bf16.mxu0 %v175_v7 }
  0x1a   :  { %v36_v9 = vld [vmem:[#allocation2 + $0x8] sm:$0xff]  ;;  %v35_v10 = vld [vmem:[#allocation2] sm:$0xff] }
  0x1b   :  { %178 = vmatpush3.bf16.msra.mxu0 %v175_v7 }
  0x1e   :  { %169 = vmatmul.mubr.msk.f32.vlgmr.msra.gmra.mrb[0].mxu0 %vm43_vm1, %v38_v8 }
  0xf1   :  { %v170_v11 = vpop.f32.mrb[0].mxu0 }
  0xf2   :  { %v126_v12 = vadd.f32 %v170_v11, %v36_v9  ;;  %v116_v13 = vpop.f32.mrb[1].mxu0 }
  0xf3   :  { %v125_v14 = vadd.f32 %v116_v13, %v35_v10 }
  0xf4   :  { %129 = vst.msk [vmem:[#allocation2 + $0x8] sm:$0xff] %vm32_vm0, %v126_v12 }
  0xf5   :  { %128 = vst.msk [vmem:[#allocation2] sm:$0xff] %vm32_vm0, %v125_v14 }
  0xfb   :  { %v134_v16 = vld [vmem:[#allocation2 + $0x8] sm:$0xff] }
  0xfc   :  { %v143_v17 = vadd.f32 %v153_v15, %v134_v16  ;;  %v133_v18 = vld [vmem:[#allocation2] sm:$0xff] }
  0xfd   :  { %v142_v19 = vadd.f32 %v153_v15, %v133_v18 }
  0xfe   :  { %145 = vst.msk [vmem:[%s267_s3 + $0x8] sm:$0xff] %vm32_vm0, %v143_v17 }
  0xff   :  { %144 = vst.msk [vmem:[%s267_s3] sm:$0xff] %vm32_vm0, %v142_v19 }
 0x100   :  { %150 = vsyncpa [#allocation4], 1 }

// kernel: transformer_encoder_layer.5
= control target key start
LH: loop header
LB: loop body
LE: loop exit
PB: predicated region body
PF: predicated region fallthrough
CT: control target
= control target key end

     0   :  { %s1445_s6 = smov 0   ;;  %s1447_s7 = smov 0   ;;  %s1637_s0 = inlined_call_operand.vmem [shape: f32[8,2,12,8], index: 0, kind: input, shape index: {}]   ;;  %s1638_s1 = inlined_call_operand.vmem [shape: f32[8,2,4,8], index: 1, kind: output, shape index: {}]  }
   0x1   :  { %s1449_s8 = smov 0  }
   0x2 LB: > { %s1280_s9 = sadd.s32 4294967295, %s1429_s8   ;;  %s1462_s10 = sadd.s32 1, %s1429_s8   ;;  %s1429_s8 = sphi %s1449_s8, %s1642_s8   ;;  %s1425_s7 = sphi %s1447_s7, %s1641_s7   ;;  %s1421_s6 = sphi %s1445_s6, %s1640_s6  }
   0x3   : > { %s15_s11 = ssub.s32 %s1429_s8, %s1462_s10  ;;  %s18_s12 = sadd.s32 1, %s1425_s7 }
   0x4   : > { %p16_p0 = scmp.eq.s32.totalorder %s15_s11, 0  ;;  %p25_p1 = scmp.ne.s32.totalorder %s1425_s7, %s1421_s6 }
   0x5   : > { %p26_p2 = scmp.eq.s32.totalorder %s1429_s8, 0  ;;  %p55_p3 = scmp.eq.s32.totalorder %s1280_s9, 1 }
   0x6   : > { %s1473_s13 = scalar_select %p16_p0, %s1425_s7, %s18_s12  }
   0x7   : > { %p27_p4 = por %p26_p2, %p25_p1  ;;  %p1475_p5 = por %p55_p3, %p25_p1 }
   0x8   : > { %p1283_p6 = scmp.ge.s32.totalorder %s1429_s8, 2 }
   0xa   : > { %77 = sbr.rel (%p1283_p6) target bundleno = 29 (0x1d), region = 16 }
  0x11   : > { %80 = sbr.rel (!%p27_p4) target bundleno = 29 (0x1d), region = 20  ;;  %s82_s15 = sand.u32 (%p27_p4), 1, %s1425_s7  }
  0x12   : > { %s1306_s16 = sshll.u32 (%p27_p4), %s1429_s8, 4  ;;  %s1284_s17 = sshll.u32 (%p27_p4), %s82_s15, 7 }
  0x13   : > { %s1485_s20 = scalar_lea.vmem (%p27_p4), %s1637_s0, %s1306_s16  ;;  %s84_s21 = scalar_lea.vmem (%p27_p4), [#allocation2], %s1284_s17 }
  0x14   : > { %v145_v0 = vld [vmem:[%s1485_s20] sm:$0xff] (%p27_p4)  ;;  %v147_v1 = vld [vmem:[%s1485_s20 + $0x8] sm:$0xff] (%p27_p4) }
  0x15   : > { %v149_v2 = vld [vmem:[%s1485_s20 + $0x20] sm:$0xff] (%p27_p4)  ;;  %146 = vst [vmem:[%s84_s21] sm:$0xff] (%p27_p4), %v145_v0  ;;  %148 = vst [vmem:[%s84_s21 + $0x8] sm:$0xff] (%p27_p4), %v147_v1  ;;  %v151_v3 = vld [vmem:[%s1485_s20 + $0x28] sm:$0xff] (%p27_p4) }
  0x16   : > { %150 = vst [vmem:[%s84_s21 + $0x10] sm:$0xff] (%p27_p4), %v149_v2  ;;  %v153_v4 = vld [vmem:[%s1485_s20 + $0x40] sm:$0xff] (%p27_p4)  ;;  %v155_v5 = vld [vmem:[%s1485_s20 + $0x48] sm:$0xff] (%p27_p4)  ;;  %152 = vst [vmem:[%s84_s21 + $0x18] sm:$0xff] (%p27_p4), %v151_v3 }
  0x17   : > { %154 = vst [vmem:[%s84_s21 + $0x20] sm:$0xff] (%p27_p4), %v153_v4  ;;  %156 = vst [vmem:[%s84_s21 + $0x28] sm:$0xff] (%p27_p4), %v155_v5  ;;  %v157_v6 = vld [vmem:[%s1485_s20 + $0x60] sm:$0xff] (%p27_p4)  ;;  %v159_v7 = vld [vmem:[%s1485_s20 + $0x68] sm:$0xff] (%p27_p4) }
  0x18   : > { %v161_v8 = vld [vmem:[%s1485_s20 + $0x80] sm:$0xff]  ;;  %158 = vst [vmem:[%s84_s21 + $0x30] sm:$0xff] %v157_v6  ;;  %160 = vst [vmem:[%s84_s21 + $0x38] sm:$0xff] %v159_v7  ;;  %v163_v9 = vld [vmem:[%s1485_s20 + $0x88] sm:$0xff] }
  0x19   : > { %162 = vst [vmem:[%s84_s21 + $0x40] sm:$0xff] %v161_v8  ;;  %v165_v10 = vld [vmem:[%s1485_s20 + $0xa0] sm:$0xff]  ;;  %v167_v11 = vld [vmem:[%s1485_s20 + $0xa8] sm:$0xff]  ;;  %164 = vst [vmem:[%s84_s21 + $0x48] sm:$0xff] %v163_v9 }
  0x1a   : > { %166 = vst [vmem:[%s84_s21 + $0x50] sm:$0xff] %v165_v10  ;;  %168 = vst [vmem:[%s84_s21 + $0x58] sm:$0xff] %v167_v11  ;;  %v169_v12 = vld [vmem:[%s1485_s20 + $0xc0] sm:$0xff]  ;;  %v171_v13 = vld [vmem:[%s1485_s20 + $0xc8] sm:$0xff] }
  0x1b   : > { %v173_v14 = vld [vmem:[%s1485_s20 + $0xe0] sm:$0xff]  ;;  %170 = vst [vmem:[%s84_s21 + $0x60] sm:$0xff] %v169_v12  ;;  %172 = vst [vmem:[%s84_s21 + $0x68] sm:$0xff] %v171_v13  ;;  %v175_v15 = vld [vmem:[%s1485_s20 + $0xe8] sm:$0xff] }
  0x1c   : > { %174 = vst [vmem:[%s84_s21 + $0x70] sm:$0xff] %v173_v14  ;;  %176 = vst [vmem:[%s84_s21 + $0x78] sm:$0xff] %v175_v15 }
  0x1d PF: > { %p1287_p7 = scmp.ge.s32.totalorder %s1429_s8, 1  ;;  %p181_p8 = scmp.lt.s32.totalorder %s1429_s8, 3 }
  0x1f   : > { %p182_p9 = pnand %p1287_p7, %p181_p8 }
  0x20   : > { %s188_s22 = sand.u32 (!%p182_p9), 1, %s1421_s6   ;;  %v227_v16 = vlaneseq (!%p182_p9)  ;;  %v1431_v17 = vmov (!%p182_p9), 0.0   ;;  %v1432_v18 = vmov (!%p182_p9), 1983009808   ;;  %v1433_v20 = vmov (!%p182_p9), 1934713408  }
  0x21   : > { %185 = sbr.rel (%p182_p9) target bundleno = 820 (0x334), region = 58  ;;  %1323 = vmatprep.subr.mxu0 (!%p182_p9), %v1431_v17  ;;  %s1288_s23 = sshll.u32 (!%p182_p9), %s188_s22, 7  ;;  %v225_v19 = vunpack.c.l.s4 (!%p182_p9), %v1432_v18  ;;  %v289_v21 = vunpack.c.l.s4 (!%p182_p9), %v1433_v20  ;;  %1328 = vmatprep.subr.mxu1 (!%p182_p9), %v1431_v17  ;;  %vm1434_vm0 = vmmov (!%p182_p9), 0   ;;  %vm430_vm1 = vcmask (!%p182_p9), 64512  }
  0x22   : > { %v228_v22 = vshrl.u32 (!%p182_p9), %v227_v16, 7  ;;  %1325 = vmatprep.mubr.msk.f32.mxu0 (!%p182_p9), %vm1434_vm0, %v1431_v17  ;;  %1330 = vmatprep.mubr.msk.f32.mxu1 (!%p182_p9), %vm1434_vm0, %v1431_v17  ;;  %s1514_s24 = scalar_lea.vmem (!%p182_p9), [#allocation2], %s1288_s23  ;;  %s1289_s25 = sshll.u32 (!%p182_p9), %s188_s22, 5  ;;  %vm1139_vm2 = vcmask (!%p182_p9), 60416  }
  0x23   : > { %v206_v23 = vld [vmem:[%s1514_s24] sm:$0xff] (!%p182_p9)  ;;  %v208_v24 = vld [vmem:[%s1514_s24 + $0x10] sm:$0xff] (!%p182_p9)  ;;  %v226_v26 = vunpack.c.0.s8 (!%p182_p9), %v225_v19  ;;  %v290_v27 = vunpack.c.0.s8 (!%p182_p9), %v289_v21  ;;  %s205_s26 = scalar_lea.vmem (!%p182_p9), [#allocation3], %s1289_s25 }
  0x24   : > { %v210_v25 = vld [vmem:[%s1514_s24 + $0x20] sm:$0xff] (!%p182_p9)  ;;  %v212_v28 = vld [vmem:[%s1514_s24 + $0x30] sm:$0xff] (!%p182_p9) }
  0x25   : > { %v214_v29 = vld [vmem:[%s1514_s24 + $0x40] sm:$0xff] (!%p182_p9)  ;;  %v216_v30 = vld [vmem:[%s1514_s24 + $0x50] sm:$0xff] (!%p182_p9)  ;;  %v222_v31 = vcombine.low (!%p182_p9), %v206_v23, %v210_v25  ;;  %v223_v32 = vcombine.high (!%p182_p9), %v206_v23, %v210_v25  ;;  %v1524_v35 = vsub.s32 (!%p182_p9), %v226_v26, %v228_v22  ;;  %v238_v36 = vcombine.low (!%p182_p9), %v208_v24, %v212_v28 }
  0x26   : > { %v218_v33 = vld [vmem:[%s1514_s24 + $0x60] sm:$0xff] (!%p182_p9)  ;;  %v220_v34 = vld [vmem:[%s1514_s24 + $0x70] sm:$0xff] (!%p182_p9)  ;;  %v239_v37 = vcombine.high (!%p182_p9), %v208_v24, %v212_v28  ;;  %v1526_v38 = vsub.s32 (!%p182_p9), %v290_v27, %v228_v22 }
  0x27   : > { %v254_v39 = vcombine.low (!%p182_p9), %v214_v29, %v218_v33  ;;  %v255_v40 = vcombine.high (!%p182_p9), %v214_v29, %v218_v33  ;;  %v270_v41 = vcombine.low (!%p182_p9), %v216_v30, %v220_v34  ;;  %v271_v42 = vcombine.high (!%p182_p9), %v216_v30, %v220_v34 }
  0x28   : > { %v237_v43 = vrot.slane %v223_v32, %v1524_v35  ;;  %v253_v44 = vrot.slane %v239_v37, %v1524_v35  ;;  %v230_v45 = vrot.slane %v222_v31, %v1524_v35  ;;  %v246_v46 = vrot.slane %v238_v36, %v1524_v35  ;;  %s1303_s27 = sshll.u32 (%p1475_p5), %s1280_s9, 2 }
  0x29   : > { %v269_v47 = vrot.slane %v255_v40, %v1524_v35  ;;  %v285_v48 = vrot.slane %v271_v42, %v1524_v35  ;;  %v262_v49 = vrot.slane %v254_v39, %v1524_v35  ;;  %v278_v50 = vrot.slane %v270_v41, %v1524_v35  ;;  %s1156_s30 = scalar_lea.vmem (%p1475_p5), %s1638_s1, %s1303_s27 }
  0x2a   : > { %v302_v51 = vcombine.low %v237_v43, %v253_v44  ;;  %v303_v52 = vcombine.high %v237_v43, %v253_v44  ;;  %v286_v53 = vcombine.low %v230_v45, %v246_v46  ;;  %v287_v54 = vcombine.high %v230_v45, %v246_v46 }
  0x2b   : > { %v334_v55 = vcombine.low %v269_v47, %v285_v48  ;;  %v335_v56 = vcombine.high %v269_v47, %v285_v48  ;;  %v318_v57 = vcombine.low %v262_v49, %v278_v50  ;;  %v319_v58 = vcombine.high %v262_v49, %v278_v50  ;;  %v207_v50 = vld [vmem:[%s1514_s24 + $0x8] sm:$0xf] }
  0x2c   : > { %v310_v59 = vrot.slane %v302_v51, %v1526_v38  ;;  %v294_v60 = vrot.slane %v286_v53, %v1526_v38  ;;  %v317_v61 = vrot.slane %v303_v52, %v1526_v38  ;;  %v301_v62 = vrot.slane %v287_v54, %v1526_v38  ;;  %v209_v51 = vld [vmem:[%s1514_s24 + $0x18] sm:$0xf]  ;;  %v211_v52 = vld [vmem:[%s1514_s24 + $0x28] sm:$0xf] }
  0x2d   : > { %v342_v63 = vrot.slane %v334_v55, %v1526_v38  ;;  %v326_v0 = vrot.slane %v318_v57, %v1526_v38  ;;  %v349_v1 = vrot.slane %v335_v56, %v1526_v38  ;;  %v333_v2 = vrot.slane %v319_v58, %v1526_v38  ;;  %v213_v53 = vld [vmem:[%s1514_s24 + $0x38] sm:$0xf]  ;;  %v215_v54 = vld [vmem:[%s1514_s24 + $0x48] sm:$0xf] }
  0x2e   : > { %v217_v55 = vld [vmem:[%s1514_s24 + $0x58] sm:$0xf]  ;;  %v358_v56 = vcombine.low %v207_v50, %v211_v52  ;;  %v219_v57 = vld [vmem:[%s1514_s24 + $0x68] sm:$0xf] }
  0x2f   : > { %v354_v3 = vcombine.low %v310_v59, %v342_v63  ;;  %v350_v4 = vcombine.low %v294_v60, %v326_v0  ;;  %v355_v5 = vcombine.high %v310_v59, %v342_v63  ;;  %v351_v6 = vcombine.high %v294_v60, %v326_v0  ;;  %v221_v58 = vld [vmem:[%s1514_s24 + $0x78] sm:$0xf] }
  0x30   : > { %v352_v7 = vcombine.low %v301_v62, %v333_v2  ;;  %v356_v9 = vcombine.low %v317_v61, %v349_v1  ;;  %v353_v10 = vcombine.high %v301_v62, %v333_v2  ;;  %v357_v12 = vcombine.high %v317_v61, %v349_v1 }
  0x31   : > { %1324 = vmatpush3.xpose.msk.msra.mxu0 %vm430_vm1, %v354_v3  ;;  %v426_v8 = vmul.f32 0.35355338, %v350_v4  ;;  %1329 = vmatpush3.xpose.msk.msra.mxu1 %vm430_vm1, %v355_v5  ;;  %v427_v11 = vmul.f32 0.35355338, %v351_v6  ;;  %v366_v59 = vcombine.low %v209_v51, %v213_v53  ;;  %v365_v60 = vrot.slane %v358_v56, %v1524_v35 }
  0x32   : > { %1333 = vmatprep.subr.mxu0 %v1431_v17  ;;  %1338 = vmatprep.subr.mxu1 %v1431_v17  ;;  %v428_v13 = vmul.f32 0.35355338, %v352_v7  ;;  %v429_v14 = vmul.f32 0.35355338, %v353_v10  ;;  %v374_v61 = vcombine.low %v215_v54, %v219_v57  ;;  %v382_v62 = vcombine.low %v217_v55, %v221_v58 }
  0x33   : > { %v373_v63 = vrot.slane %v366_v59, %v1524_v35 }
  0x34   : > { %1326 = vmatmul.mubr.msk.f32.vlgmr.msra.gmra.mrb[0].mxu0 %vm430_vm1, %v426_v8  ;;  %1331 = vmatmul.mubr.msk.f32.vlgmr.msra.gmra.mrb[0].mxu1 %vm430_vm1, %v427_v11  ;;  %v381_v0 = vrot.slane %v374_v61, %v1524_v35  ;;  %v389_v1 = vrot.slane %v382_v62, %v1524_v35 }
  0x35   : > { %1334 = vmatpush3.xpose.msk.msra.mxu0 %vm430_vm1, %v356_v9  ;;  %1335 = vmatprep.mubr.msk.f32.mxu0 %vm1434_vm0, %v1431_v17  ;;  %v390_v2 = vcombine.low %v365_v60, %v373_v63  ;;  %v391_v6 = vcombine.high %v365_v60, %v373_v63 }
  0x36   : > { %1339 = vmatpush3.xpose.msk.msra.mxu1 %vm430_vm1, %v357_v12  ;;  %1340 = vmatprep.mubr.msk.f32.mxu1 %vm1434_vm0, %v1431_v17  ;;  %v406_v3 = vcombine.low %v381_v0, %v389_v1  ;;  %v407_v7 = vcombine.high %v381_v0, %v389_v1 }
  0x37   : > { %1343 = vmatprep.subr.mxu0 %v1431_v17  ;;  %1348 = vmatprep.subr.mxu1 %v1431_v17  ;;  %v398_v4 = vrot.slane %v390_v2, %v1526_v38  ;;  %v405_v9 = vrot.slane %v391_v6, %v1526_v38 }
  0x38   : > { %1336 = vmatmul.mubr.msk.f32.vlgmr.msra.gmra.mrb[2].mxu0 %vm430_vm1, %v428_v13  ;;  %v414_v5 = vrot.slane %v406_v3, %v1526_v38  ;;  %v421_v10 = vrot.slane %v407_v7, %v1526_v38 }
  0x39   : > { %1341 = vmatmul.mubr.msk.f32.vlgmr.msra.gmra.mrb[2].mxu1 %vm430_vm1, %v429_v14  ;;  %1345 = vmatprep.mubr.msk.f32.mxu0 %vm1434_vm0, %v1431_v17 }
  0x3a   : > { %1350 = vmatprep.mubr.msk.f32.mxu1 %vm1434_vm0, %v1431_v17  ;;  %v422_v8 = vcombine.low %v398_v4, %v414_v5  ;;  %v423_v11 = vcombine.high %v398_v4, %v414_v5  ;;  %v424_v12 = vcombine.low %v405_v9, %v421_v10  ;;  %v425_v13 = vcombine.high %v405_v9, %v421_v10 }
  0x3c   : > { %1344 = vmatpush3.msra.mxu0 %v422_v8  ;;  %1349 = vmatpush3.msra.mxu1 %v423_v11 }
  0x3d   : > { %1353 = vmatprep.subr.mxu0 %v1431_v17  ;;  %1358 = vmatprep.subr.mxu1 %v1431_v17 }
 0x107   : > { %v503_v15 = vpop.f32.mrb[0].mxu0  ;;  %v579_v16 = vpop.f32.mrb[0].mxu1 }
 0x108   : > { %v1327_v18 = vpop.f32.mrb[1].mxu0  ;;  %v735_v19 = vsel %vm430_vm1, %v503_v15, -inf  ;;  %v1332_v20 = vpop.f32.mrb[1].mxu1  ;;  %v738_v21 = vsel %vm430_vm1, %v579_v16, -inf }
 0x109   : > { %736 = vmax.xlane.f32.xlu0 %v735_v19 }
 0x10b   : > { %v655_v22 = vpop.f32.mrb[2].mxu0 }
 0x10c   : > { %v1337_v23 = vpop.f32.mrb[3].mxu0  ;;  %v741_v24 = vsel %vm430_vm1, %v655_v22, -inf  ;;  %v731_v25 = vpop.f32.mrb[2].mxu1 }
 0x10d   : > { %739 = vmax.xlane.f32.xlu0 %v738_v21  ;;  %742 = vmax.xlane.f32.xlu1 %v741_v24  ;;  %v1342_v26 = vpop.f32.mrb[3].mxu1  ;;  %v744_v27 = vsel %vm430_vm1, %v731_v25, -inf }
 0x111   : > { %745 = vmax.xlane.f32.xlu1 %v744_v27 }
 0x196   : > { %v737_v28 = vpop.xlane.xlu0 %736 }
 0x197   : > { %v747_v29 = vsub.f32 %v503_v15, %v737_v28 }
 0x199   : > { %v751_v30 = vmul.f32 1.442695, %v747_v29 }
 0x19a   : > { %v740_v31 = vpop.xlane.xlu0 %739  ;;  %v743_v32 = vpop.xlane.xlu1 %742 }
 0x19b   : > { %1391 = vpow2.f32 %v751_v30  ;;  %v748_v33 = vsub.f32 %v579_v16, %v740_v31  ;;  %v749_v34 = vsub.f32 %v655_v22, %v743_v32 }
 0x19d   : > { %v753_v36 = vmul.f32 1.442695, %v748_v33  ;;  %v755_v37 = vmul.f32 1.442695, %v749_v34 }
 0x19e   : > { %v746_v39 = vpop.xlane.xlu1 %745 }
 0x19f   : > { %1393 = vpow2.f32 %v753_v36  ;;  %v750_v40 = vsub.f32 %v731_v25, %v746_v39 }
 0x1a0   : > { %1395 = vpow2.f32 %v755_v37 }
 0x1a1   : > { %v757_v41 = vmul.f32 1.442695, %v750_v40 }
 0x1a3   : > { %1397 = vpow2.f32 %v757_v41 }
 0x1a5   : > { %v1392_v42 = vpop.eup %1391 }
 0x1a6   : > { %v759_v43 = vsel %vm430_vm1, %v1392_v42, 0.0 }
 0x1a7   : > { %760 = vadd.xlane.f32.xlu0 %v759_v43 }
 0x1a9   : > { %v1394_v44 = vpop.eup %1393 }
 0x1aa   : > { %v1396_v45 = vpop.eup %1395  ;;  %v762_v46 = vsel %vm430_vm1, %v1394_v44, 0.0 }
 0x1ab   : > { %763 = vadd.xlane.f32.xlu1 %v762_v46  ;;  %v765_v47 = vsel %vm430_vm1, %v1396_v45, 0.0 }
 0x1ac   : > { %766 = vadd.xlane.f32.xlu0 %v765_v47 }
 0x1ad   : > { %v1398_v48 = vpop.eup %1397 }
 0x1ae   : > { %v768_v49 = vsel %vm430_vm1, %v1398_v48, 0.0 }
 0x1af   : > { %769 = vadd.xlane.f32.xlu1 %v768_v49 }
 0x234   : > { %v761_v14 = vpop.xlane.xlu0 %760 }
 0x235   : > { %1399 = vrcp.f32 %v761_v14 }
 0x238   : > { %v764_v15 = vpop.xlane.xlu1 %763 }
 0x239   : > { %v767_v16 = vpop.xlane.xlu0 %766  ;;  %1401 = vrcp.f32 %v764_v15 }
 0x23a   : > { %1403 = vrcp.f32 %v767_v16 }
 0x23c   : > { %v770_v18 = vpop.xlane.xlu1 %769 }
 0x23d   : > { %1405 = vrcp.f32 %v770_v18 }
 0x23f   : > { %v1400_v19 = vpop.eup %1399 }
 0x240   : > { %v775_v20 = vmul.f32 %v1400_v19, %v1392_v42 }
 0x242   : > { %1346 = vmatmul.mubr.msk.f32.vlgmr.msra.gmra.mrb[4].mxu0 %vm430_vm1, %v775_v20 }
 0x243   : > { %v1402_v21 = vpop.eup %1401  ;;  %1354 = vmatpush3.msra.mxu0 %v424_v12  ;;  %1355 = vmatprep.mubr.msk.f32.mxu0 %vm1434_vm0, %v1431_v17 }
 0x244   : > { %v1404_v22 = vpop.eup %1403  ;;  %v776_v23 = vmul.f32 %v1402_v21, %v1394_v44 }
 0x245   : > { %v777_v24 = vmul.f32 %v1404_v22, %v1396_v45 }
 0x246   : > { %1351 = vmatmul.mubr.msk.f32.vlgmr.msra.gmra.mrb[4].mxu1 %vm430_vm1, %v776_v23 }
 0x247   : > { %v1406_v25 = vpop.eup %1405  ;;  %1356 = vmatmul.mubr.msk.f32.vlgmr.msra.gmra.mrb[6].mxu0 %vm430_vm1, %v777_v24  ;;  %1359 = vmatpush3.msra.mxu1 %v425_v13 }
 0x248   : > { %v778_v26 = vmul.f32 %v1406_v25, %v1398_v48  ;;  %1360 = vmatprep.mubr.msk.f32.mxu1 %vm1434_vm0, %v1431_v17 }
 0x24a   : > { %1361 = vmatmul.mubr.msk.f32.vlgmr.msra.gmra.mrb[6].mxu1 %vm430_vm1, %v778_v26 }
 0x315   : > { %v848_v27 = vpop.f32.mrb[4].mxu0 }
 0x316   : > { %v1347_v28 = vpop.f32.mrb[5].mxu0 }
 0x319   : > { %v921_v29 = vpop.f32.mrb[4].mxu1 }
 0x31a   : > { %v994_v30 = vpop.f32.mrb[6].mxu0  ;;  %v1352_v31 = vpop.f32.mrb[5].mxu1 }
 0x31b   : > { %v1071_v32 = vcombine.low %v848_v27, %v994_v30  ;;  %v1072_v33 = vcombine.high %v848_v27, %v994_v30  ;;  %v1357_v34 = vpop.f32.mrb[7].mxu0 }
 0x31d   : > { %v1067_v36 = vpop.f32.mrb[6].mxu1  ;;  %v1079_v41 = vrot.slane %v1071_v32, %v1524_v35  ;;  %v1086_v42 = vrot.slane %v1072_v33, %v1524_v35 }
 0x31e   : > { %v1087_v37 = vcombine.low %v921_v29, %v1067_v36  ;;  %v1088_v39 = vcombine.high %v921_v29, %v1067_v36  ;;  %v1362_v40 = vpop.f32.mrb[7].mxu1 }
 0x320   : > { %v1095_v43 = vrot.slane %v1087_v37, %v1524_v35  ;;  %v1102_v44 = vrot.slane %v1088_v39, %v1524_v35 }
 0x322   : > { %v1103_v45 = vcombine.low %v1079_v41, %v1095_v43  ;;  %v1104_v46 = vcombine.high %v1079_v41, %v1095_v43  ;;  %v1119_v47 = vcombine.low %v1086_v42, %v1102_v44  ;;  %v1120_v48 = vcombine.high %v1086_v42, %v1102_v44 }
 0x324   : > { %v1111_v49 = vrot.slane %v1103_v45, %v1526_v38  ;;  %v1118_v50 = vrot.slane %v1104_v46, %v1526_v38  ;;  %v1127_v51 = vrot.slane %v1119_v47, %v1526_v38  ;;  %v1134_v52 = vrot.slane %v1120_v48, %v1526_v38  ;;  %1154 = sbr.rel (!%p1475_p5) target bundleno = 820 (0x334), region = 66 }
 0x326   : > { %v1135_v53 = vcombine.high %v1111_v49, %v1431_v17  ;;  %v1136_v54 = vcombine.high %v1118_v50, %v1431_v17  ;;  %v1137_v55 = vcombine.high %v1127_v51, %v1431_v17  ;;  %v1138_v35 = vcombine.high %v1134_v52, %v1431_v17  ;;  %1140 = vst.msk [vmem:[%s205_s26] sm:$0xf] %vm1139_vm2, %v1111_v49 }
 0x327   : > { %1142 = vst.msk [vmem:[%s205_s26 + $0x8] sm:$0xf] %vm1139_vm2, %v1118_v50  ;;  %1144 = vst.msk [vmem:[%s205_s26 + $0x10] sm:$0xf] %vm1139_vm2, %v1127_v51 }
 0x328   : > { %1146 = vst.msk [vmem:[%s205_s26 + $0x18] sm:$0xf] %vm1139_vm2, %v1134_v52  ;;  %1141 = vst.msk [vmem:[%s205_s26 + $0x4] sm:$0xf] %vm1139_vm2, %v1135_v53 }
 0x329   : > { %1143 = vst.msk [vmem:[%s205_s26 + $0xc] sm:$0xf] %vm1139_vm2, %v1136_v54  ;;  %1145 = vst.msk [vmem:[%s205_s26 + $0x14] sm:$0xf] %vm1139_vm2, %v1137_v55 }
 0x32a   : > { %1147 = vst.msk [vmem:[%s205_s26 + $0x1c] sm:$0xf] %vm1139_vm2, %v1138_v35 }
 0x32d   : > { %v1172_v17 = vld [vmem:[%s205_s26] sm:$0xf] }
 0x32e   : > { %v1176_v56 = vld [vmem:[%s205_s26 + $0x8] sm:$0xf]  ;;  %v1180_v58 = vld [vmem:[%s205_s26 + $0x10] sm:$0xf]  ;;  %1173 = vst [vmem:[%s1156_s30] sm:$0xf] %v1172_v17 }
 0x32f   : > { %v1174_v38 = vld [vmem:[%s205_s26 + $0x4] sm:$0xf]  ;;  %1177 = vst [vmem:[%s1156_s30 + $0x10] sm:$0xf] %v1176_v56  ;;  %1181 = vst [vmem:[%s1156_s30 + $0x20] sm:$0xf] %v1180_v58 }
 0x330   : > { %v1178_v57 = vld [vmem:[%s205_s26 + $0xc] sm:$0xf]  ;;  %1175 = vst [vmem:[%s1156_s30 + $0x8] sm:$0xf] %v1174_v38  ;;  %v1182_v59 = vld [vmem:[%s205_s26 + $0x14] sm:$0xf] }
 0x331   : > { %1179 = vst [vmem:[%s1156_s30 + $0x18] sm:$0xf] %v1178_v57  ;;  %v1184_v60 = vld [vmem:[%s205_s26 + $0x18] sm:$0xf]  ;;  %v1186_v61 = vld [vmem:[%s205_s26 + $0x1c] sm:$0xf] }
 0x332   : > { %1183 = vst [vmem:[%s1156_s30 + $0x28] sm:$0xf] %v1182_v59  ;;  %1185 = vst [vmem:[%s1156_s30 + $0x30] sm:$0xf] %v1184_v60 }
 0x333   : > { %1187 = vst [vmem:[%s1156_s30 + $0x38] sm:$0xf] %v1186_v61 }
 0x334 PF: > { %p8_p10 = scmp.ge.s32.totalorder %s1462_s10, 4   ;;  %s1640_s6 = smov %s1425_s7 }
 0x335   : > { %s1641_s7 = smov %s1473_s13  ;;  %s1642_s8 = smov %s1462_s10 }
 0x336   :  { %10 = sbr.rel (!%p8_p10) target bundleno = 2 (0x2), region = 138 }

// kernel: transformer_encoder_layer.6
= control target key start
LH: loop header
LB: loop body
LE: loop exit
PB: predicated region body
PF: predicated region fallthrough
CT: control target
= control target key end

     0   :  { %vm27_vm0 = vcmask 261120   ;;  %v228_v3 = vmov 0.0   ;;  %s315_s1 = inlined_call_operand.vmem [shape: f32[32,32], index: 1, kind: input, shape index: {}]   ;;  %s316_s0 = inlined_call_operand.vmem [shape: f32[16,32], index: 0, kind: input, shape index: {}]   ;;  %s317_s2 = inlined_call_operand.vmem [shape: f32[1,32], index: 2, kind: input, shape index: {}]   ;;  %s318_s3 = inlined_call_operand.vmem [shape: f32[16,32], index: 3, kind: input, shape index: {}]   ;;  %s319_s4 = inlined_call_operand.vmem [shape: f32[1,32], index: 4, kind: input, shape index: {}]   ;;  %s320_s5 = inlined_call_operand.vmem [shape: f32[1,32], index: 5, kind: input, shape index: {}]   ;;  %s321_s6 = inlined_call_operand.vmem [shape: f32[16,32], index: 6, kind: output, shape index: {}]  }
   0x1   :  { %v34_v0 = vld [vmem:[%s315_s1] sm:$0xff]  ;;  %v35_v1 = vld [vmem:[%s315_s1 + $0x8] sm:$0xff]  ;;  %v36_v2 = vld [vmem:[%s315_s1 + $0x10] sm:$0xff]  ;;  %29 = vst.msk [vmem:[#allocation2 + $0x8] sm:$0xff] %vm27_vm0, %v228_v3 }
   0x2   :  { %28 = vst.msk [vmem:[#allocation2] sm:$0xff] %vm27_vm0, %v228_v3  ;;  %v215_v4 = vpack.c.bf16 %v35_v1, %v34_v0  ;;  %v37_v5 = vld [vmem:[%s315_s1 + $0x18] sm:$0xff]  ;;  %v32_v6 = vld [vmem:[%s316_s0] sm:$0xff]  ;;  %v33_v8 = vld [vmem:[%s316_s0 + $0x8] sm:$0xff] }
   0x3   :  { %v219_v7 = vpack.c.bf16 %v37_v5, %v36_v2  ;;  %212 = vmatprep.mubr.msk.f32.mxu0 %vm27_vm0, %v32_v6  ;;  %v195_v15 = vld [vmem:[%s317_s2] ss:$0 sm:$0xff]  ;;  %v139_v21 = vld [vmem:[%s318_s3 + $0x8] sm:$0xff] }
   0x4   :  { %216 = vmatprep.subr.bf16.mxu0 %v215_v4  ;;  %v138_v18 = vld [vmem:[%s318_s3] sm:$0xff] }
   0x5   :  { %218 = vmatpush3.bf16.msra.mxu0 %v215_v4  ;;  %v196_v43 = vld [vmem:[%s319_s4] ss:$0 sm:$0xff] }
   0x6   :  { %220 = vmatprep.subr.bf16.mxu0 %v219_v7  ;;  %v197_v45 = vld [vmem:[%s320_s5] ss:$0 sm:$0xff] }
   0x8   :  { %v31_v9 = vld [vmem:[#allocation2 + $0x8] sm:$0xff] }
   0x9   :  { %222 = vmatpush3.bf16.msra.mxu0 %v219_v7  ;;  %v30_v10 = vld [vmem:[#allocation2] sm:$0xff] }
   0xc   :  { %213 = vmatmul.mubr.msk.f32.vlgmr.msra.gmra.mrb[0].mxu0 %vm27_vm0, %v33_v8 }
  0xdf   :  { %v214_v11 = vpop.f32.mrb[0].mxu0 }
  0xe0   :  { %v121_v12 = vadd.f32 %v214_v11, %v31_v9  ;;  %v111_v13 = vpop.f32.mrb[1].mxu0 }
  0xe1   :  { %v120_v14 = vadd.f32 %v111_v13, %v30_v10 }
  0xe2   :  { %123 = vst.msk [vmem:[#allocation2 + $0x8] sm:$0xff] %vm27_vm0, %v121_v12 }
  0xe3   :  { %122 = vst.msk [vmem:[#allocation2] sm:$0xff] %vm27_vm0, %v120_v14 }
  0xe9   :  { %v128_v16 = vld [vmem:[#allocation2 + $0x8] sm:$0xff] }
  0xea   :  { %v127_v17 = vld [vmem:[#allocation2] sm:$0xff]  ;;  %v137_v20 = vadd.f32 %v195_v15, %v128_v16 }
  0xeb   :  { %v136_v19 = vadd.f32 %v195_v15, %v127_v17 }
  0xec   :  { %v141_v24 = vadd.f32 %v139_v21, %v137_v20 }
  0xed   :  { %v140_v22 = vadd.f32 %v138_v18, %v136_v19 }
  0xee   :  { %v145_v25 = vsel %vm27_vm0, %v141_v24, 0.0 }
  0xef   :  { %v142_v23 = vsel %vm27_vm0, %v140_v22, 0.0 }
  0xf0   :  { %143 = vadd.xlane.f32.xlu0 %v142_v23 }
  0xf4   :  { %146 = vadd.xlane.f32.xlu0 %v145_v25 }
 0x17d   :  { %v144_v26 = vpop.xlane.xlu0 %143 }
 0x17e   :  { %v149_v27 = vmul.f32 0.03125, %v144_v26 }
 0x180   :  { %v151_v28 = vsub.f32 %v140_v22, %v149_v27 }
 0x181   :  { %v147_v29 = vpop.xlane.xlu0 %146 }
 0x182   :  { %v150_v30 = vmul.f32 0.03125, %v147_v29  ;;  %v153_v31 = vmul.f32 %v151_v28, %v151_v28 }
 0x184   :  { %v152_v32 = vsub.f32 %v141_v24, %v150_v30  ;;  %v155_v33 = vsel %vm27_vm0, %v153_v31, 0.0 }
 0x185   :  { %156 = vadd.xlane.f32.xlu1 %v155_v33 }
 0x186   :  { %v154_v34 = vmul.f32 %v152_v32, %v152_v32 }
 0x188   :  { %v158_v35 = vsel %vm27_vm0, %v154_v34, 0.0 }
 0x189   :  { %159 = vadd.xlane.f32.xlu1 %v158_v35 }
 0x212   :  { %v157_v36 = vpop.xlane.xlu1 %156 }
 0x213   :  { %v161_v37 = vmul.f32 0.03125, %v157_v36 }
 0x215   :  { %v163_v38 = vadd.f32 1e-05, %v161_v37 }
 0x216   :  { %v160_v39 = vpop.xlane.xlu1 %159 }
 0x217   :  { %224 = vrsqrt.f32 %v163_v38  ;;  %v162_v40 = vmul.f32 0.03125, %v160_v39 }
 0x219   :  { %v164_v41 = vadd.f32 1e-05, %v162_v40 }
 0x21b   :  { %226 = vrsqrt.f32 %v164_v41 }
 0x221   :  { %v225_v42 = vpop.eup %224 }
 0x222   :  { %v167_v44 = vmul.f32 %v225_v42, %v151_v28 }
 0x224   :  { %v176_v46 = vmul.f32 %v196_v43, %v167_v44 }
 0x225   :  { %v227_v47 = vpop.eup %226 }
 0x226   :  { %v185_v48 = vadd.f32 %v197_v45, %v176_v46  ;;  %v168_v49 = vmul.f32 %v227_v47, %v152_v32 }
 0x228   :  { %187 = vst.msk [vmem:[%s321_s6] sm:$0xff] %vm27_vm0, %v185_v48  ;;  %v177_v50 = vmul.f32 %v196_v43, %v168_v49 }
 0x22a   :  { %v186_v51 = vadd.f32 %v197_v45, %v177_v50 }
 0x22c   :  { %188 = vst.msk [vmem:[%s321_s6 + $0x8] sm:$0xff] %vm27_vm0, %v186_v51 }

// kernel: transformer_encoder_layer.7
= control target key start
LH: loop header
LB: loop body
LE: loop exit
PB: predicated region body
PF: predicated region fallthrough
CT: control target
= control target key end

     0   :  { %vm31_vm0 = vcmask 261120   ;;  %s540_s0 = inlined_call_operand.vmem [shape: f32[16,32], index: 0, kind: input, shape index: {}]   ;;  %s541_s1 = inlined_call_operand.vmem [shape: f32[32,64], index: 1, kind: input, shape index: {}]   ;;  %s542_s2 = inlined_call_operand.vmem [shape: f32[1,64], index: 2, kind: input, shape index: {}]   ;;  %s543_s3 = inlined_call_operand.vmem [shape: f32[64,32], index: 3, kind: input, shape index: {}]   ;;  %s544_s4 = inlined_call_operand.vmem [shape: f32[1,32], index: 4, kind: input, shape index: {}]   ;;  %s545_s5 = inlined_call_operand.vmem [shape: f32[1,32], index: 5, kind: input, shape index: {}]   ;;  %s546_s6 = inlined_call_operand.vmem [shape: f32[1,32], index: 6, kind: input, shape index: {}]   ;;  %s547_s7 = inlined_call_operand.hbm [shape: f32[16,32], index: 7, kind: output, shape index: {}]  }
   0x1   :  { %v36_v0 = vld [vmem:[%s541_s1] sm:$0xff]  ;;  %v37_v1 = vld [vmem:[%s541_s1 + $0x8] sm:$0xff]  ;;  %v38_v2 = vld [vmem:[%s541_s1 + $0x10] sm:$0xff] }
   0x2   :  { %v362_v3 = vpack.c.bf16 %v37_v1, %v36_v0  ;;  %v39_v4 = vld [vmem:[%s541_s1 + $0x18] sm:$0xff]  ;;  %v34_v5 = vld [vmem:[%s540_s0] sm:$0xff]  ;;  %v134_v8 = vld [vmem:[%s543_s3 + $0x8] sm:$0xff] }
   0x3   :  { %v366_v6 = vpack.c.bf16 %v39_v4, %v38_v2  ;;  %340 = vmatprep.mubr.msk.f32.mxu0 %vm31_vm0, %v34_v5  ;;  %v133_v7 = vld [vmem:[%s543_s3] sm:$0xff]  ;;  %v135_v9 = vld [vmem:[%s543_s3 + $0x10] sm:$0xff]  ;;  %v136_v11 = vld [vmem:[%s543_s3 + $0x18] sm:$0xff] }
   0x4   :  { %363 = vmatprep.subr.bf16.mxu0 %v362_v3  ;;  %v370_v10 = vpack.c.bf16 %v134_v8, %v133_v7  ;;  %v374_v12 = vpack.c.bf16 %v136_v11, %v135_v9  ;;  %v137_v13 = vld [vmem:[%s543_s3 + $0x20] sm:$0xff]  ;;  %v138_v14 = vld [vmem:[%s543_s3 + $0x28] sm:$0xff] }
   0x5   :  { %365 = vmatpush3.bf16.msra.mxu0 %v362_v3 }
   0x6   :  { %12 = vsyncpa [#allocation4], 0  ;;  %367 = vmatprep.subr.bf16.mxu0 %v366_v6  ;;  %371 = vmatprep.subr.bf16.mxu1 %v370_v10  ;;  %v378_v15 = vpack.c.bf16 %v138_v14, %v137_v13  ;;  %v35_v16 = vld [vmem:[%s540_s0 + $0x8] sm:$0xff]  ;;  %v139_v17 = vld [vmem:[%s543_s3 + $0x30] sm:$0xff]  ;;  %v418_v20 = vmov 0.0   ;;  %vm141_vm1 = vcmask 523264  }
   0x7   :  { %373 = vmatpush3.bf16.msra.mxu1 %v370_v10  ;;  %v140_v18 = vld [vmem:[%s543_s3 + $0x38] sm:$0xff]  ;;  %33 = vst.msk [vmem:[#allocation2 + $0x8] sm:$0xff] %vm31_vm0, %v418_v20  ;;  %32 = vst.msk [vmem:[#allocation2] sm:$0xff] %vm31_vm0, %v418_v20  ;;  %v308_v21 = vld [vmem:[%s542_s2] ss:$0 sm:$0xff]  ;;  %s419_s9 = smov [#allocation3]  }
   0x8   :  { %375 = vmatprep.subr.bf16.mxu1 %v374_v12  ;;  %v382_v19 = vpack.c.bf16 %v140_v18, %v139_v17  ;;  %v313_v34 = vld [vmem:[%s544_s4] ss:$0 sm:$0xff]  ;;  %s297_s10 = sshll.u32 %s419_s9, 4  ;;  %s298_s10 = int_to_ptr.vmem [resolvable:$true] %s297_s10 }
   0x9   :  { %369 = vmatpush3.bf16.msra.mxu0 %v366_v6  ;;  %v314_v60 = vld [vmem:[%s545_s5] ss:$0 sm:$0xff]  ;;  %s394_s11 = scalar_lea.vmem %s298_s10, 256  ;;  %p399_p1 = scmp.lt.s32.totalorder %s298_s10, %s298_s10 }
   0xa   :  { %v315_v62 = vld [vmem:[%s546_s6] ss:$0 sm:$0xff]  ;;  %p395_p0 = scmp.ne.s32.totalorder %s298_s10, %s394_s11  ;;  %p400_p2 = scmp.lt.s32.totalorder %s394_s11, %s394_s11 }
   0xb   :  { %377 = vmatpush3.bf16.msra.mxu1 %v374_v12 }
   0xc   :  { %341 = vmatmul.mubr.msk.f32.vlgmr.msra.gmra.mrb[0].mxu0 %vm31_vm0, %v35_v16  ;;  %379 = vmatprep.subr.bf16.mxu1 %v378_v15  ;;  %p401_p3 = por %p400_p2, %p399_p1 }
   0xe   :  { %v132_v28 = vld [vmem:[#allocation2 + $0x8] sm:$0xff]  ;;  %v131_v29 = vld [vmem:[#allocation2] sm:$0xff]  ;;  %p402_p4 = pnand %p401_p3, %p395_p0 }
   0xf   :  { %381 = vmatpush3.bf16.msra.mxu1 %v378_v15 }
  0x10   :  { %383 = vmatprep.subr.bf16.mxu1 %v382_v19 }
  0x13   :  { %385 = vmatpush3.bf16.msra.mxu1 %v382_v19 }
  0xdf   :  { %v342_v22 = vpop.f32.mrb[0].mxu0 }
  0xe0   :  { %v126_v23 = vadd.f32 %v342_v22, %v308_v21  ;;  %v120_v24 = vpop.f32.mrb[1].mxu0 }
  0xe1   :  { %v121_v25 = vadd.f32 %v308_v21, %v120_v24 }
  0xe2   :  { %v130_v27 = vmax.f32 %v126_v23, 0.0 }
  0xe3   :  { %v129_v26 = vmax.f32 %v121_v25, 0.0 }
  0xe5   :  { %359 = vmatprep.mubr.msk.f32.mxu1 %vm141_vm1, %v129_v26 }
  0xe6   :  { %360 = vmatmul.mubr.msk.f32.vlgmr.msra.gmra.mrb[0].mxu1 %vm141_vm1, %v130_v27 }
 0x1b9   :  { %v361_v30 = vpop.f32.mrb[0].mxu1 }
 0x1ba   :  { %v224_v31 = vadd.f32 %v361_v30, %v132_v28  ;;  %v214_v32 = vpop.f32.mrb[1].mxu1 }
 0x1bb   :  { %v223_v33 = vadd.f32 %v214_v32, %v131_v29 }
 0x1bc   :  { %226 = vst.msk [vmem:[#allocation2 + $0x8] sm:$0xff] %vm31_vm0, %v224_v31 }
 0x1bd   :  { %225 = vst.msk [vmem:[#allocation2] sm:$0xff] %vm31_vm0, %v223_v33 }
 0x1c3   :  { %v231_v35 = vld [vmem:[#allocation2 + $0x8] sm:$0xff] }
 0x1c4   :  { %v230_v36 = vld [vmem:[#allocation2] sm:$0xff]  ;;  %v240_v38 = vadd.f32 %v313_v34, %v231_v35 }
 0x1c5   :  { %v239_v37 = vadd.f32 %v313_v34, %v230_v36 }
 0x1c6   :  { %v244_v41 = vadd.f32 %v240_v38, %v35_v16 }
 0x1c7   :  { %v243_v39 = vadd.f32 %v239_v37, %v34_v5 }
 0x1c8   :  { %v248_v42 = vsel %vm31_vm0, %v244_v41, 0.0 }
 0x1c9   :  { %v245_v40 = vsel %vm31_vm0, %v243_v39, 0.0 }
 0x1ca   :  { %246 = vadd.xlane.f32.xlu0 %v245_v40 }
 0x1ce   :  { %249 = vadd.xlane.f32.xlu0 %v248_v42 }
 0x257   :  { %v247_v43 = vpop.xlane.xlu0 %246 }
 0x258   :  { %v252_v44 = vmul.f32 0.03125, %v247_v43 }
 0x25a   :  { %v254_v45 = vsub.f32 %v243_v39, %v252_v44 }
 0x25b   :  { %v250_v46 = vpop.xlane.xlu0 %249 }
 0x25c   :  { %v253_v47 = vmul.f32 0.03125, %v250_v46  ;;  %v256_v48 = vmul.f32 %v254_v45, %v254_v45 }
 0x25e   :  { %v255_v49 = vsub.f32 %v244_v41, %v253_v47  ;;  %v258_v50 = vsel %vm31_vm0, %v256_v48, 0.0 }
 0x25f   :  { %259 = vadd.xlane.f32.xlu1 %v258_v50 }
 0x260   :  { %v257_v51 = vmul.f32 %v255_v49, %v255_v49 }
 0x262   :  { %v261_v52 = vsel %vm31_vm0, %v257_v51, 0.0 }
 0x263   :  { %262 = vadd.xlane.f32.xlu1 %v261_v52 }
 0x2ec   :  { %v260_v53 = vpop.xlane.xlu1 %259 }
 0x2ed   :  { %v264_v54 = vmul.f32 0.03125, %v260_v53 }
 0x2ef   :  { %v266_v55 = vadd.f32 1e-05, %v264_v54 }
 0x2f0   :  { %v263_v56 = vpop.xlane.xlu1 %262 }
 0x2f1   :  { %390 = vrsqrt.f32 %v266_v55  ;;  %v265_v57 = vmul.f32 0.03125, %v263_v56 }
 0x2f3   :  { %v267_v58 = vadd.f32 1e-05, %v265_v57 }
 0x2f5   :  { %392 = vrsqrt.f32 %v267_v58 }
 0x2fb   :  { %v391_v59 = vpop.eup %390 }
 0x2fc   :  { %v270_v61 = vmul.f32 %v391_v59, %v254_v45 }
 0x2fe   :  { %v279_v63 = vmul.f32 %v314_v60, %v270_v61 }
 0x2ff   :  { %v393_v0 = vpop.eup %392 }
 0x300   :  { %v271_v1 = vmul.f32 %v393_v0, %v255_v49  ;;  %v288_v2 = vadd.f32 %v315_v62, %v279_v63 }
 0x302   :  { %v280_v3 = vmul.f32 %v314_v60, %v271_v1  ;;  %290 = vst.msk [vmem:[#allocation3] sm:$0xff] %vm31_vm0, %v288_v2 }
 0x304   :  { %v289_v4 = vadd.f32 %v315_v62, %v280_v3 }
 0x306   :  { %291 = vst.msk [vmem:[#allocation3 + $0x8] sm:$0xff] %vm31_vm0, %v289_v4 }
 0x307   :  { %405 = shalt.err (!%p402_p4)
}
 0x308   :  { %s406_s12 = scalar_lea.hbm %s547_s7, 256 }
 0x309   :  { %p407_p5 = scmp.ne.s32.totalorder %s547_s7, %s406_s12  ;;  %p410_p6 = scmp.lt.u32.totalorder %s406_s12, %s547_s7 }
 0x30b   :  { %p412_p7 = pnand %p410_p6, %p407_p5 }
 0x30d   :  { %415 = shalt.err (!%p412_p7)
}
 0x30e   :  { %s420_s1 = smov 128   ;;  %s421_s17 = smov 8  }
 0x30f   :  { %303 = dma.vmem_to_hbm [thread:$0]  %s298_s10, 256, %s547_s7, [#allocation4], %s420_s1, %s420_s1, %s421_s17  }
 0x310   :  { %416 = dma.done.wait [#allocation4], 256  }
 0x311   :  { %417 = vsyncadd [#allocation4], 4294967040 }
 0x312   :  { %307 = vsyncpa [#allocation4], 1 }

</bundles_post_ra>
